<compile_context>
chip_gen: v6e
topology: v6e:2x2x1
jax: 0.10.0
libtpu: 0.0.40
codegen_flags: <defaults>
</compile_context>

<pallas_src>
import functools

import numpy as np

import jax
import jax.numpy as jnp
from jax.experimental import pallas as pl
from jax.experimental.pallas import tpu as pltpu


_CONST_KEYS = ("T1cat", "bias1", "C1e", "C1o", "U2cat", "bias2", "C2e", "C2o",
               "lw1p", "lb1", "lw2", "lb2", "lw3", "lb3", "lw4", "lb4")


# ----------------------------------------------------------------------------
# Fused kernel: conv1+relu+pool -> conv2+relu+pool -> flatten -> 4 linears
# ----------------------------------------------------------------------------
def _fused_cnn_kernel(x_ref, t1_ref, b1_ref, c1e_ref, c1o_ref,
                      u2_ref, b2_ref, c2e_ref, c2o_ref,
                      lw1_ref, lb1_ref, lw2_ref, lb2_ref,
                      lw3_ref, lb3_ref, lw4_ref, lb4_ref,
                      out_ref, p1s_ref, p2s_ref, *, bt):
    bf16 = jnp.bfloat16

    def mm(a, b):  # MXU matmul: bf16 operands, f32 accumulation
        return jnp.dot(a.astype(bf16), b, preferred_element_type=jnp.float32)

    def patches(src_ref, img_rows, n_out, parity):
        """Height-im2col for one parity of the (conv + 2x2 row-pool) fusion.

        For image b and pooled row q it gathers the 5 kernel rows
        src[b*img_rows + 2*q + parity + kh, :] (kh = 0..4), kh-major along
        lanes -> (bt*n_out, 5*width).  Pure strided ref reads + concats:
        no selector matmuls, no reshapes.
        """
        per_image = []
        for b in range(bt):
            base = b * img_rows + parity
            parts = [src_ref[pl.ds(base + kh, n_out, stride=2), :]
                     for kh in range(5)]
            per_image.append(jnp.concatenate(parts, axis=1))
        return jnp.concatenate(per_image, axis=0)

    # ---- conv1 (single deep-K matmul per parity) + bias + ReLU + maxpool ----
    ye = mm(patches(x_ref, 28, 12, 0), t1_ref[...])              # (bt*12, 240)
    yo = mm(patches(x_ref, 28, 12, 1), t1_ref[...])
    yr = jnp.maximum(jnp.maximum(ye, yo) + b1_ref[...], 0.0)     # f32 VPU
    yrb = yr.astype(bf16)
    p1s_ref[...] = jnp.maximum(mm(yrb, c1e_ref[...]),            # width pool
                               mm(yrb, c1o_ref[...]))            # (bt*12, 120)

    # ---- conv2 (single deep-K matmul per parity) + bias + ReLU + maxpool ----
    ye2 = mm(patches(p1s_ref, 12, 4, 0), u2_ref[...])            # (bt*4, 160)
    yo2 = mm(patches(p1s_ref, 12, 4, 1), u2_ref[...])
    yr2 = jnp.maximum(jnp.maximum(ye2, yo2) + b2_ref[...], 0.0)
    yr2b = yr2.astype(bf16)
    p2s_ref[...] = jnp.maximum(mm(yr2b, c2e_ref[...]),
                               mm(yr2b, c2o_ref[...]))           # (bt*4, 80)

    # ---- flatten to lane-dense (bt, 320) + single K=320 linear1, then MLP ----
    flat = jnp.concatenate(
        [p2s_ref[pl.ds(ph2, bt, stride=4), :] for ph2 in range(4)], axis=1)
    h = jnp.maximum(mm(flat, lw1_ref[...]) + lb1_ref[...], 0.0)
    h = jnp.maximum(mm(h, lw2_ref[...]) + lb2_ref[...], 0.0)
    h = jnp.maximum(mm(h, lw3_ref[...]) + lb3_ref[...], 0.0)
    out_ref[...] = mm(h, lw4_ref[...]) + lb4_ref[...]            # (bt, 10)


def _pick_batch_tile(B):
    # Largest tile whose second-minor block dims stay 8-aligned (or == full
    # array) while keeping the per-image unrolled loops small.
    for cand in (32, 16, 8):
        if B % cand == 0:
            return cand
    return B


def simple_cnn_forward(x, prep, *, bt=None):
    """x: (B, 1, 28, 28) float32, prep: preprocessed constants -> (B, 10)."""
    B = x.shape[0]
    if bt is None:
        bt = _pick_batch_tile(B)
    assert B % bt == 0, (B, bt)
    x2d = x.reshape(B * 28, 28)          # C=1, so NCHW -> (B*28, 28) is a view
    consts = [prep[k] for k in _CONST_KEYS]

    def const_spec(c):                   # resident in VMEM across grid steps
        return pl.BlockSpec(c.shape, lambda i: (0, 0))

    in_specs = ([pl.BlockSpec((bt * 28, 28), lambda i: (i, 0))] +
                [const_spec(c) for c in consts])

    flops = B * 2 * (2 * 12 * 140 * 240 + 2 * 12 * 240 * 120 +
                     2 * 4 * 600 * 160 + 2 * 4 * 160 * 80 +
                     320 * 256 + 256 * 128 + 128 * 64 + 64 * 10)
    bytes_accessed = int(x.size) * 4 + B * 10 * 4 + sum(
        int(c.size) * c.dtype.itemsize for c in consts)

    return pl.pallas_call(
        functools.partial(_fused_cnn_kernel, bt=bt),
        out_shape=jax.ShapeDtypeStruct((B, 10), jnp.float32),
        grid=(B // bt,),
        in_specs=in_specs,
        out_specs=pl.BlockSpec((bt, 10), lambda i: (i, 0)),
        scratch_shapes=[pltpu.VMEM((bt * 12, 120), jnp.float32),
                        pltpu.VMEM((bt * 4, 80), jnp.float32)],
        compiler_params=pltpu.CompilerParams(
            dimension_semantics=("parallel",)),   # v7x: 2 TCs split the batch
        cost_estimate=pl.CostEstimate(flops=flops, transcendentals=0,
                                      bytes_accessed=bytes_accessed),
    )(x2d, *consts)


# ----------------------------------------------------------------------------
# One-time host-side preprocessing (batch-size independent)
# ----------------------------------------------------------------------------
def preprocess_params(p):
    w1 = np.asarray(p["w1"], np.float32)   # (10, 1, 5, 5)
    w2 = np.asarray(p["w2"], np.float32)   # (20, 10, 5, 5)

    # conv1 banded weights, stacked over kh: (5*28, 10*24)
    T1 = np.zeros((5, 28, 10, 24), np.float32)
    for kh in range(5):
        for kw in range(5):
            for ow in range(24):
                T1[kh, ow + kw, :, ow] = w1[:, 0, kh, kw]
    T1cat = T1.reshape(140, 240)

    # conv2 banded weights, stacked over kh: (5*10*12, 20*8)
    U2 = np.zeros((5, 10, 12, 20, 8), np.float32)
    for kh in range(5):
        for kw in range(5):
            for ow in range(8):
                U2[kh, :, ow + kw, :, ow] = w2[:, :, kh, kw].T
    U2cat = U2.reshape(600, 160)

    # width-pool even/odd column selectors (0/1, exact in bf16)
    C1 = np.zeros((2, 240, 120), np.float32)
    C2 = np.zeros((2, 160, 80), np.float32)
    for par in range(2):
        for oc in range(10):
            for q in range(12):
                C1[par, oc * 24 + 2 * q + par, oc * 12 + q] = 1.0
        for oc in range(20):
            for q in range(4):
                C2[par, oc * 8 + 2 * q + par, oc * 4 + q] = 1.0

    # linear1 rows permuted: PyTorch flatten index oc2*16+ph2*4+pw2 -> kernel
    # order ph2*80 + oc2*4 + pw2 (so the in-kernel flatten matches .view(B,-1))
    lw1 = np.asarray(p["lw1"], np.float32)                    # (320, 256)
    old = np.empty(320, np.int64)
    for ph2 in range(4):
        for oc2 in range(20):
            for pw2 in range(4):
                old[ph2 * 80 + oc2 * 4 + pw2] = oc2 * 16 + ph2 * 4 + pw2
    lw1p = lw1[old]

    f32 = lambda a: jnp.asarray(a, jnp.float32)
    b16 = lambda a: jnp.asarray(a, jnp.bfloat16)
    return {
        "T1cat": b16(T1cat),
        "bias1": f32(np.repeat(np.asarray(p["b1"]), 24).reshape(1, 240)),
        "C1e": b16(C1[0]), "C1o": b16(C1[1]),
        "U2cat": b16(U2cat),
        "bias2": f32(np.repeat(np.asarray(p["b2"]), 8).reshape(1, 160)),
        "C2e": b16(C2[0]), "C2o": b16(C2[1]),
        "lw1p": b16(lw1p), "lb1": f32(np.asarray(p["lb1"]).reshape(1, 256)),
        "lw2": b16(np.asarray(p["lw2"])), "lb2": f32(np.asarray(p["lb2"]).reshape(1, 128)),
        "lw3": b16(np.asarray(p["lw3"])), "lb3": f32(np.asarray(p["lb3"]).reshape(1, 64)),
        "lw4": b16(np.asarray(p["lw4"])), "lb4": f32(np.asarray(p["lb4"]).reshape(1, 10)),
    }


# ----------------------------------------------------------------------------
# Synthetic parameters (PyTorch layouts; linears stored as (in, out))
# ----------------------------------------------------------------------------
def init_params(key):
    def uniform(k, shape, fan_in):
        bound = 1.0 / jnp.sqrt(jnp.float32(fan_in))
        return jax.random.uniform(k, shape, jnp.float32, -bound, bound)

    keys = jax.random.split(key, 12)
    return {
        "w1": uniform(keys[0], (10, 1, 5, 5), 25),
        "b1": uniform(keys[1], (10,), 25),
        "w2": uniform(keys[2], (20, 10, 5, 5), 250),
        "b2": uniform(keys[3], (20,), 250),
        "lw1": uniform(keys[4], (320, 256), 320),
        "lb1": uniform(keys[5], (256,), 320),
        "lw2": uniform(keys[6], (256, 128), 256),
        "lb2": uniform(keys[7], (128,), 256),
        "lw3": uniform(keys[8], (128, 64), 128),
        "lb3": uniform(keys[9], (64,), 128),
        "lw4": uniform(keys[10], (64, 10), 64),
        "lb4": uniform(keys[11], (10,), 64),
    }


# ----------------------------------------------------------------------------
# Pure-JAX reference (sanity check only)
# ----------------------------------------------------------------------------
def reference_forward(x, p):
    def conv(x, w, b):
        y = jax.lax.conv_general_dilated(
            x, w, window_strides=(1, 1), padding="VALID",
            dimension_numbers=("NCHW", "OIHW", "NCHW"))
        return jax.nn.relu(y + b[None, :, None, None])

    def pool(x):
        return jax.lax.reduce_window(
            x, -jnp.inf, jax.lax.max, (1, 1, 2, 2), (1, 1, 2, 2), "VALID")

    x = pool(conv(x, p["w1"], p["b1"]))
    x = pool(conv(x, p["w2"], p["b2"]))
    x = x.reshape(x.shape[0], -1)
    x = jax.nn.relu(x @ p["lw1"] + p["lb1"])
    x = jax.nn.relu(x @ p["lw2"] + p["lb2"])
    x = jax.nn.relu(x @ p["lw3"] + p["lb3"])
    return x @ p["lw4"] + p["lb4"]


if __name__ == "__main__":
    key = jax.random.PRNGKey(0)
    k_x, k_p = jax.random.split(key)
    # MNIST-style input implied by the module (flatten -> 320 => 28x28 input).
    x = jax.random.normal(k_x, (2, 1, 28, 28), dtype=jnp.float32)
    params = init_params(k_p)
    prep = preprocess_params(params)       # batch-size independent now

    fwd = jax.jit(simple_cnn_forward)
    out = jax.block_until_ready(fwd(x, prep))
    assert out.shape == (2, 10), out.shape

    ref = jax.block_until_ready(reference_forward(x, params))
    if not jnp.allclose(out, ref, rtol=2e-2, atol=2e-2):   # bf16-operand path
        max_err = jnp.max(jnp.abs(out - ref))
        raise AssertionError(f"Pallas output mismatch vs JAX reference: {max_err}")

    print("KERNEL_OK")
</pallas_src>

<mosaic_0001>
module attributes {stable_mosaic.version = 11 : i64} {
  func.func @_fused_cnn_kernel(%arg0: i32, %arg1: memref<56x28xf32, #tpu.memory_space<vmem>>, %arg2: memref<140x240xbf16, #tpu.memory_space<vmem>>, %arg3: memref<1x240xf32, #tpu.memory_space<vmem>>, %arg4: memref<240x120xbf16, #tpu.memory_space<vmem>>, %arg5: memref<240x120xbf16, #tpu.memory_space<vmem>>, %arg6: memref<600x160xbf16, #tpu.memory_space<vmem>>, %arg7: memref<1x160xf32, #tpu.memory_space<vmem>>, %arg8: memref<160x80xbf16, #tpu.memory_space<vmem>>, %arg9: memref<160x80xbf16, #tpu.memory_space<vmem>>, %arg10: memref<320x256xbf16, #tpu.memory_space<vmem>>, %arg11: memref<1x256xf32, #tpu.memory_space<vmem>>, %arg12: memref<256x128xbf16, #tpu.memory_space<vmem>>, %arg13: memref<1x128xf32, #tpu.memory_space<vmem>>, %arg14: memref<128x64xbf16, #tpu.memory_space<vmem>>, %arg15: memref<1x64xf32, #tpu.memory_space<vmem>>, %arg16: memref<64x10xbf16, #tpu.memory_space<vmem>>, %arg17: memref<1x10xf32, #tpu.memory_space<vmem>>, %arg18: memref<2x10xf32, #tpu.memory_space<vmem>>, %arg19: memref<24x120xf32, #tpu.memory_space<vmem>>, %arg20: memref<8x80xf32, #tpu.memory_space<vmem>>) attributes {dimension_semantics = [#tpu.dimension_semantics<parallel>], iteration_bounds = array<i64: 1>, scalar_prefetch = 0 : i64, scratch_operands = 2 : i64, tpu.core_type = #tpu.core_type<tc>, window_params = [{transform_indices = @transform_0, window_bounds = array<i64: 56, 28>}, {pipeline_mode = #tpu.pipeline_mode<synchronous>, transform_indices = @transform_1, window_bounds = array<i64: 140, 240>}, {pipeline_mode = #tpu.pipeline_mode<synchronous>, transform_indices = @transform_2, window_bounds = array<i64: 1, 240>}, {pipeline_mode = #tpu.pipeline_mode<synchronous>, transform_indices = @transform_3, window_bounds = array<i64: 240, 120>}, {pipeline_mode = #tpu.pipeline_mode<synchronous>, transform_indices = @transform_4, window_bounds = array<i64: 240, 120>}, {pipeline_mode = #tpu.pipeline_mode<synchronous>, transform_indices = @transform_5, window_bounds = array<i64: 600, 160>}, {pipeline_mode = #tpu.pipeline_mode<synchronous>, transform_indices = @transform_6, window_bounds = array<i64: 1, 160>}, {pipeline_mode = #tpu.pipeline_mode<synchronous>, transform_indices = @transform_7, window_bounds = array<i64: 160, 80>}, {pipeline_mode = #tpu.pipeline_mode<synchronous>, transform_indices = @transform_8, window_bounds = array<i64: 160, 80>}, {pipeline_mode = #tpu.pipeline_mode<synchronous>, transform_indices = @transform_9, window_bounds = array<i64: 320, 256>}, {pipeline_mode = #tpu.pipeline_mode<synchronous>, transform_indices = @transform_10, window_bounds = array<i64: 1, 256>}, {pipeline_mode = #tpu.pipeline_mode<synchronous>, transform_indices = @transform_11, window_bounds = array<i64: 256, 128>}, {pipeline_mode = #tpu.pipeline_mode<synchronous>, transform_indices = @transform_12, window_bounds = array<i64: 1, 128>}, {pipeline_mode = #tpu.pipeline_mode<synchronous>, transform_indices = @transform_13, window_bounds = array<i64: 128, 64>}, {pipeline_mode = #tpu.pipeline_mode<synchronous>, transform_indices = @transform_14, window_bounds = array<i64: 1, 64>}, {pipeline_mode = #tpu.pipeline_mode<synchronous>, transform_indices = @transform_15, window_bounds = array<i64: 64, 10>}, {pipeline_mode = #tpu.pipeline_mode<synchronous>, transform_indices = @transform_16, window_bounds = array<i64: 1, 10>}, {transform_indices = @transform_17, window_bounds = array<i64: 2, 10>}]} {
    %c0 = arith.constant 0 : index
    %c0_0 = arith.constant 0 : index
    %0 = tpu.strided_load %arg1[%c0, %c0_0] {strides = array<i32: 2, 1>} : memref<56x28xf32, #tpu.memory_space<vmem>>, vector<12x28xf32>
    %c1 = arith.constant 1 : index
    %c0_1 = arith.constant 0 : index
    %1 = tpu.strided_load %arg1[%c1, %c0_1] {strides = array<i32: 2, 1>} : memref<56x28xf32, #tpu.memory_space<vmem>>, vector<12x28xf32>
    %c2 = arith.constant 2 : index
    %c0_2 = arith.constant 0 : index
    %2 = tpu.strided_load %arg1[%c2, %c0_2] {strides = array<i32: 2, 1>} : memref<56x28xf32, #tpu.memory_space<vmem>>, vector<12x28xf32>
    %c3 = arith.constant 3 : index
    %c0_3 = arith.constant 0 : index
    %3 = tpu.strided_load %arg1[%c3, %c0_3] {strides = array<i32: 2, 1>} : memref<56x28xf32, #tpu.memory_space<vmem>>, vector<12x28xf32>
    %c4 = arith.constant 4 : index
    %c0_4 = arith.constant 0 : index
    %4 = tpu.strided_load %arg1[%c4, %c0_4] {strides = array<i32: 2, 1>} : memref<56x28xf32, #tpu.memory_space<vmem>>, vector<12x28xf32>
    %5 = tpu.concatenate %0, %1, %2, %3, %4 in 1 : vector<12x28xf32>, vector<12x28xf32>, vector<12x28xf32>, vector<12x28xf32>, vector<12x28xf32> -> vector<12x140xf32>
    %c28 = arith.constant 28 : index
    %c0_5 = arith.constant 0 : index
    %6 = tpu.strided_load %arg1[%c28, %c0_5] {strides = array<i32: 2, 1>} : memref<56x28xf32, #tpu.memory_space<vmem>>, vector<12x28xf32>
    %c29 = arith.constant 29 : index
    %c0_6 = arith.constant 0 : index
    %7 = tpu.strided_load %arg1[%c29, %c0_6] {strides = array<i32: 2, 1>} : memref<56x28xf32, #tpu.memory_space<vmem>>, vector<12x28xf32>
    %c30 = arith.constant 30 : index
    %c0_7 = arith.constant 0 : index
    %8 = tpu.strided_load %arg1[%c30, %c0_7] {strides = array<i32: 2, 1>} : memref<56x28xf32, #tpu.memory_space<vmem>>, vector<12x28xf32>
    %c31 = arith.constant 31 : index
    %c0_8 = arith.constant 0 : index
    %9 = tpu.strided_load %arg1[%c31, %c0_8] {strides = array<i32: 2, 1>} : memref<56x28xf32, #tpu.memory_space<vmem>>, vector<12x28xf32>
    %c32 = arith.constant 32 : index
    %c0_9 = arith.constant 0 : index
    %10 = tpu.strided_load %arg1[%c32, %c0_9] {strides = array<i32: 2, 1>} : memref<56x28xf32, #tpu.memory_space<vmem>>, vector<12x28xf32>
    %11 = tpu.concatenate %6, %7, %8, %9, %10 in 1 : vector<12x28xf32>, vector<12x28xf32>, vector<12x28xf32>, vector<12x28xf32>, vector<12x28xf32> -> vector<12x140xf32>
    %12 = tpu.concatenate %5, %11 in 0 : vector<12x140xf32>, vector<12x140xf32> -> vector<24x140xf32>
    %c0_10 = arith.constant 0 : index
    %c0_11 = arith.constant 0 : index
    %13 = vector.load %arg2[%c0_10, %c0_11] : memref<140x240xbf16, #tpu.memory_space<vmem>>, vector<140x240xbf16>
    %14 = arith.truncf %12 : vector<24x140xf32> to vector<24x140xbf16>
    %cst = arith.constant dense<0.000000e+00> : vector<24x240xf32>
    %15 = tpu.matmul %14, %13, %cst {dimension_numbers = #tpu.dot_dimension_numbers<[1], [0], [0], [1], [0, 0, 1, 1], [], []>} : vector<24x140xbf16>, vector<140x240xbf16>, vector<24x240xf32> -> vector<24x240xf32>
    %c1_12 = arith.constant 1 : index
    %c0_13 = arith.constant 0 : index
    %16 = tpu.strided_load %arg1[%c1_12, %c0_13] {strides = array<i32: 2, 1>} : memref<56x28xf32, #tpu.memory_space<vmem>>, vector<12x28xf32>
    %c2_14 = arith.constant 2 : index
    %c0_15 = arith.constant 0 : index
    %17 = tpu.strided_load %arg1[%c2_14, %c0_15] {strides = array<i32: 2, 1>} : memref<56x28xf32, #tpu.memory_space<vmem>>, vector<12x28xf32>
    %c3_16 = arith.constant 3 : index
    %c0_17 = arith.constant 0 : index
    %18 = tpu.strided_load %arg1[%c3_16, %c0_17] {strides = array<i32: 2, 1>} : memref<56x28xf32, #tpu.memory_space<vmem>>, vector<12x28xf32>
    %c4_18 = arith.constant 4 : index
    %c0_19 = arith.constant 0 : index
    %19 = tpu.strided_load %arg1[%c4_18, %c0_19] {strides = array<i32: 2, 1>} : memref<56x28xf32, #tpu.memory_space<vmem>>, vector<12x28xf32>
    %c5 = arith.constant 5 : index
    %c0_20 = arith.constant 0 : index
    %20 = tpu.strided_load %arg1[%c5, %c0_20] {strides = array<i32: 2, 1>} : memref<56x28xf32, #tpu.memory_space<vmem>>, vector<12x28xf32>
    %21 = tpu.concatenate %16, %17, %18, %19, %20 in 1 : vector<12x28xf32>, vector<12x28xf32>, vector<12x28xf32>, vector<12x28xf32>, vector<12x28xf32> -> vector<12x140xf32>
    %c29_21 = arith.constant 29 : index
    %c0_22 = arith.constant 0 : index
    %22 = tpu.strided_load %arg1[%c29_21, %c0_22] {strides = array<i32: 2, 1>} : memref<56x28xf32, #tpu.memory_space<vmem>>, vector<12x28xf32>
    %c30_23 = arith.constant 30 : index
    %c0_24 = arith.constant 0 : index
    %23 = tpu.strided_load %arg1[%c30_23, %c0_24] {strides = array<i32: 2, 1>} : memref<56x28xf32, #tpu.memory_space<vmem>>, vector<12x28xf32>
    %c31_25 = arith.constant 31 : index
    %c0_26 = arith.constant 0 : index
    %24 = tpu.strided_load %arg1[%c31_25, %c0_26] {strides = array<i32: 2, 1>} : memref<56x28xf32, #tpu.memory_space<vmem>>, vector<12x28xf32>
    %c32_27 = arith.constant 32 : index
    %c0_28 = arith.constant 0 : index
    %25 = tpu.strided_load %arg1[%c32_27, %c0_28] {strides = array<i32: 2, 1>} : memref<56x28xf32, #tpu.memory_space<vmem>>, vector<12x28xf32>
    %c33 = arith.constant 33 : index
    %c0_29 = arith.constant 0 : index
    %26 = tpu.strided_load %arg1[%c33, %c0_29] {strides = array<i32: 2, 1>} : memref<56x28xf32, #tpu.memory_space<vmem>>, vector<12x28xf32>
    %27 = tpu.concatenate %22, %23, %24, %25, %26 in 1 : vector<12x28xf32>, vector<12x28xf32>, vector<12x28xf32>, vector<12x28xf32>, vector<12x28xf32> -> vector<12x140xf32>
    %28 = tpu.concatenate %21, %27 in 0 : vector<12x140xf32>, vector<12x140xf32> -> vector<24x140xf32>
    %c0_30 = arith.constant 0 : index
    %c0_31 = arith.constant 0 : index
    %29 = vector.load %arg2[%c0_30, %c0_31] : memref<140x240xbf16, #tpu.memory_space<vmem>>, vector<140x240xbf16>
    %30 = arith.truncf %28 : vector<24x140xf32> to vector<24x140xbf16>
    %cst_32 = arith.constant dense<0.000000e+00> : vector<24x240xf32>
    %31 = tpu.matmul %30, %29, %cst_32 {dimension_numbers = #tpu.dot_dimension_numbers<[1], [0], [0], [1], [0, 0, 1, 1], [], []>} : vector<24x140xbf16>, vector<140x240xbf16>, vector<24x240xf32> -> vector<24x240xf32>
    %32 = arith.maximumf %15, %31 : vector<24x240xf32>
    %c0_33 = arith.constant 0 : index
    %c0_34 = arith.constant 0 : index
    %33 = vector.load %arg3[%c0_33, %c0_34] : memref<1x240xf32, #tpu.memory_space<vmem>>, vector<1x240xf32>
    %34 = vector.broadcast %33 : vector<1x240xf32> to vector<24x240xf32>
    %35 = arith.addf %32, %34 : vector<24x240xf32>
    %cst_35 = arith.constant 0.000000e+00 : f32
    %36 = vector.broadcast %cst_35 : f32 to vector<24x240xf32>
    %37 = arith.maximumf %35, %36 : vector<24x240xf32>
    %38 = arith.truncf %37 : vector<24x240xf32> to vector<24x240xbf16>
    %c0_36 = arith.constant 0 : index
    %c0_37 = arith.constant 0 : index
    %39 = vector.load %arg4[%c0_36, %c0_37] : memref<240x120xbf16, #tpu.memory_space<vmem>>, vector<240x120xbf16>
    %cst_38 = arith.constant dense<0.000000e+00> : vector<24x120xf32>
    %40 = tpu.matmul %38, %39, %cst_38 {dimension_numbers = #tpu.dot_dimension_numbers<[1], [0], [0], [1], [0, 0, 1, 1], [], []>} : vector<24x240xbf16>, vector<240x120xbf16>, vector<24x120xf32> -> vector<24x120xf32>
    %c0_39 = arith.constant 0 : index
    %c0_40 = arith.constant 0 : index
    %41 = vector.load %arg5[%c0_39, %c0_40] : memref<240x120xbf16, #tpu.memory_space<vmem>>, vector<240x120xbf16>
    %cst_41 = arith.constant dense<0.000000e+00> : vector<24x120xf32>
    %42 = tpu.matmul %38, %41, %cst_41 {dimension_numbers = #tpu.dot_dimension_numbers<[1], [0], [0], [1], [0, 0, 1, 1], [], []>} : vector<24x240xbf16>, vector<240x120xbf16>, vector<24x120xf32> -> vector<24x120xf32>
    %43 = arith.maximumf %40, %42 : vector<24x120xf32>
    %c0_42 = arith.constant 0 : index
    %c0_43 = arith.constant 0 : index
    %44 = vector.load %arg19[%c0_42, %c0_43] : memref<24x120xf32, #tpu.memory_space<vmem>>, vector<24x120xf32>
    tpu.vector_store %arg19[%c0_42, %c0_43], %43 {strides = array<i32>} : memref<24x120xf32, #tpu.memory_space<vmem>>, vector<24x120xf32>,
    %c0_44 = arith.constant 0 : index
    %c0_45 = arith.constant 0 : index
    %45 = tpu.strided_load %arg19[%c0_44, %c0_45] {strides = array<i32: 2, 1>} : memref<24x120xf32, #tpu.memory_space<vmem>>, vector<4x120xf32>
    %c1_46 = arith.constant 1 : index
    %c0_47 = arith.constant 0 : index
    %46 = tpu.strided_load %arg19[%c1_46, %c0_47] {strides = array<i32: 2, 1>} : memref<24x120xf32, #tpu.memory_space<vmem>>, vector<4x120xf32>
    %c2_48 = arith.constant 2 : index
    %c0_49 = arith.constant 0 : index
    %47 = tpu.strided_load %arg19[%c2_48, %c0_49] {strides = array<i32: 2, 1>} : memref<24x120xf32, #tpu.memory_space<vmem>>, vector<4x120xf32>
    %c3_50 = arith.constant 3 : index
    %c0_51 = arith.constant 0 : index
    %48 = tpu.strided_load %arg19[%c3_50, %c0_51] {strides = array<i32: 2, 1>} : memref<24x120xf32, #tpu.memory_space<vmem>>, vector<4x120xf32>
    %c4_52 = arith.constant 4 : index
    %c0_53 = arith.constant 0 : index
    %49 = tpu.strided_load %arg19[%c4_52, %c0_53] {strides = array<i32: 2, 1>} : memref<24x120xf32, #tpu.memory_space<vmem>>, vector<4x120xf32>
    %50 = tpu.concatenate %45, %46, %47, %48, %49 in 1 : vector<4x120xf32>, vector<4x120xf32>, vector<4x120xf32>, vector<4x120xf32>, vector<4x120xf32> -> vector<4x600xf32>
    %c12 = arith.constant 12 : index
    %c0_54 = arith.constant 0 : index
    %51 = tpu.strided_load %arg19[%c12, %c0_54] {strides = array<i32: 2, 1>} : memref<24x120xf32, #tpu.memory_space<vmem>>, vector<4x120xf32>
    %c13 = arith.constant 13 : index
    %c0_55 = arith.constant 0 : index
    %52 = tpu.strided_load %arg19[%c13, %c0_55] {strides = array<i32: 2, 1>} : memref<24x120xf32, #tpu.memory_space<vmem>>, vector<4x120xf32>
    %c14 = arith.constant 14 : index
    %c0_56 = arith.constant 0 : index
    %53 = tpu.strided_load %arg19[%c14, %c0_56] {strides = array<i32: 2, 1>} : memref<24x120xf32, #tpu.memory_space<vmem>>, vector<4x120xf32>
    %c15 = arith.constant 15 : index
    %c0_57 = arith.constant 0 : index
    %54 = tpu.strided_load %arg19[%c15, %c0_57] {strides = array<i32: 2, 1>} : memref<24x120xf32, #tpu.memory_space<vmem>>, vector<4x120xf32>
    %c16 = arith.constant 16 : index
    %c0_58 = arith.constant 0 : index
    %55 = tpu.strided_load %arg19[%c16, %c0_58] {strides = array<i32: 2, 1>} : memref<24x120xf32, #tpu.memory_space<vmem>>, vector<4x120xf32>
    %56 = tpu.concatenate %51, %52, %53, %54, %55 in 1 : vector<4x120xf32>, vector<4x120xf32>, vector<4x120xf32>, vector<4x120xf32>, vector<4x120xf32> -> vector<4x600xf32>
    %57 = tpu.concatenate %50, %56 in 0 : vector<4x600xf32>, vector<4x600xf32> -> vector<8x600xf32>
    %c0_59 = arith.constant 0 : index
    %c0_60 = arith.constant 0 : index
    %58 = vector.load %arg6[%c0_59, %c0_60] : memref<600x160xbf16, #tpu.memory_space<vmem>>, vector<600x160xbf16>
    %59 = arith.truncf %57 : vector<8x600xf32> to vector<8x600xbf16>
    %cst_61 = arith.constant dense<0.000000e+00> : vector<8x160xf32>
    %60 = tpu.matmul %59, %58, %cst_61 {dimension_numbers = #tpu.dot_dimension_numbers<[1], [0], [0], [1], [0, 0, 1, 1], [], []>} : vector<8x600xbf16>, vector<600x160xbf16>, vector<8x160xf32> -> vector<8x160xf32>
    %c1_62 = arith.constant 1 : index
    %c0_63 = arith.constant 0 : index
    %61 = tpu.strided_load %arg19[%c1_62, %c0_63] {strides = array<i32: 2, 1>} : memref<24x120xf32, #tpu.memory_space<vmem>>, vector<4x120xf32>
    %c2_64 = arith.constant 2 : index
    %c0_65 = arith.constant 0 : index
    %62 = tpu.strided_load %arg19[%c2_64, %c0_65] {strides = array<i32: 2, 1>} : memref<24x120xf32, #tpu.memory_space<vmem>>, vector<4x120xf32>
    %c3_66 = arith.constant 3 : index
    %c0_67 = arith.constant 0 : index
    %63 = tpu.strided_load %arg19[%c3_66, %c0_67] {strides = array<i32: 2, 1>} : memref<24x120xf32, #tpu.memory_space<vmem>>, vector<4x120xf32>
    %c4_68 = arith.constant 4 : index
    %c0_69 = arith.constant 0 : index
    %64 = tpu.strided_load %arg19[%c4_68, %c0_69] {strides = array<i32: 2, 1>} : memref<24x120xf32, #tpu.memory_space<vmem>>, vector<4x120xf32>
    %c5_70 = arith.constant 5 : index
    %c0_71 = arith.constant 0 : index
    %65 = tpu.strided_load %arg19[%c5_70, %c0_71] {strides = array<i32: 2, 1>} : memref<24x120xf32, #tpu.memory_space<vmem>>, vector<4x120xf32>
    %66 = tpu.concatenate %61, %62, %63, %64, %65 in 1 : vector<4x120xf32>, vector<4x120xf32>, vector<4x120xf32>, vector<4x120xf32>, vector<4x120xf32> -> vector<4x600xf32>
    %c13_72 = arith.constant 13 : index
    %c0_73 = arith.constant 0 : index
    %67 = tpu.strided_load %arg19[%c13_72, %c0_73] {strides = array<i32: 2, 1>} : memref<24x120xf32, #tpu.memory_space<vmem>>, vector<4x120xf32>
    %c14_74 = arith.constant 14 : index
    %c0_75 = arith.constant 0 : index
    %68 = tpu.strided_load %arg19[%c14_74, %c0_75] {strides = array<i32: 2, 1>} : memref<24x120xf32, #tpu.memory_space<vmem>>, vector<4x120xf32>
    %c15_76 = arith.constant 15 : index
    %c0_77 = arith.constant 0 : index
    %69 = tpu.strided_load %arg19[%c15_76, %c0_77] {strides = array<i32: 2, 1>} : memref<24x120xf32, #tpu.memory_space<vmem>>, vector<4x120xf32>
    %c16_78 = arith.constant 16 : index
    %c0_79 = arith.constant 0 : index
    %70 = tpu.strided_load %arg19[%c16_78, %c0_79] {strides = array<i32: 2, 1>} : memref<24x120xf32, #tpu.memory_space<vmem>>, vector<4x120xf32>
    %c17 = arith.constant 17 : index
    %c0_80 = arith.constant 0 : index
    %71 = tpu.strided_load %arg19[%c17, %c0_80] {strides = array<i32: 2, 1>} : memref<24x120xf32, #tpu.memory_space<vmem>>, vector<4x120xf32>
    %72 = tpu.concatenate %67, %68, %69, %70, %71 in 1 : vector<4x120xf32>, vector<4x120xf32>, vector<4x120xf32>, vector<4x120xf32>, vector<4x120xf32> -> vector<4x600xf32>
    %73 = tpu.concatenate %66, %72 in 0 : vector<4x600xf32>, vector<4x600xf32> -> vector<8x600xf32>
    %c0_81 = arith.constant 0 : index
    %c0_82 = arith.constant 0 : index
    %74 = vector.load %arg6[%c0_81, %c0_82] : memref<600x160xbf16, #tpu.memory_space<vmem>>, vector<600x160xbf16>
    %75 = arith.truncf %73 : vector<8x600xf32> to vector<8x600xbf16>
    %cst_83 = arith.constant dense<0.000000e+00> : vector<8x160xf32>
    %76 = tpu.matmul %75, %74, %cst_83 {dimension_numbers = #tpu.dot_dimension_numbers<[1], [0], [0], [1], [0, 0, 1, 1], [], []>} : vector<8x600xbf16>, vector<600x160xbf16>, vector<8x160xf32> -> vector<8x160xf32>
    %77 = arith.maximumf %60, %76 : vector<8x160xf32>
    %c0_84 = arith.constant 0 : index
    %c0_85 = arith.constant 0 : index
    %78 = vector.load %arg7[%c0_84, %c0_85] : memref<1x160xf32, #tpu.memory_space<vmem>>, vector<1x160xf32>
    %79 = vector.broadcast %78 : vector<1x160xf32> to vector<8x160xf32>
    %80 = arith.addf %77, %79 : vector<8x160xf32>
    %cst_86 = arith.constant 0.000000e+00 : f32
    %81 = vector.broadcast %cst_86 : f32 to vector<8x160xf32>
    %82 = arith.maximumf %80, %81 : vector<8x160xf32>
    %83 = arith.truncf %82 : vector<8x160xf32> to vector<8x160xbf16>
    %c0_87 = arith.constant 0 : index
    %c0_88 = arith.constant 0 : index
    %84 = vector.load %arg8[%c0_87, %c0_88] : memref<160x80xbf16, #tpu.memory_space<vmem>>, vector<160x80xbf16>
    %cst_89 = arith.constant dense<0.000000e+00> : vector<8x80xf32>
    %85 = tpu.matmul %83, %84, %cst_89 {dimension_numbers = #tpu.dot_dimension_numbers<[1], [0], [0], [1], [0, 0, 1, 1], [], []>} : vector<8x160xbf16>, vector<160x80xbf16>, vector<8x80xf32> -> vector<8x80xf32>
    %c0_90 = arith.constant 0 : index
    %c0_91 = arith.constant 0 : index
    %86 = vector.load %arg9[%c0_90, %c0_91] : memref<160x80xbf16, #tpu.memory_space<vmem>>, vector<160x80xbf16>
    %cst_92 = arith.constant dense<0.000000e+00> : vector<8x80xf32>
    %87 = tpu.matmul %83, %86, %cst_92 {dimension_numbers = #tpu.dot_dimension_numbers<[1], [0], [0], [1], [0, 0, 1, 1], [], []>} : vector<8x160xbf16>, vector<160x80xbf16>, vector<8x80xf32> -> vector<8x80xf32>
    %88 = arith.maximumf %85, %87 : vector<8x80xf32>
    %c0_93 = arith.constant 0 : index
    %c0_94 = arith.constant 0 : index
    %89 = vector.load %arg20[%c0_93, %c0_94] : memref<8x80xf32, #tpu.memory_space<vmem>>, vector<8x80xf32>
    tpu.vector_store %arg20[%c0_93, %c0_94], %88 {strides = array<i32>} : memref<8x80xf32, #tpu.memory_space<vmem>>, vector<8x80xf32>,
    %c0_95 = arith.constant 0 : index
    %c0_96 = arith.constant 0 : index
    %90 = tpu.strided_load %arg20[%c0_95, %c0_96] {strides = array<i32: 4, 1>} : memref<8x80xf32, #tpu.memory_space<vmem>>, vector<2x80xf32>
    %c1_97 = arith.constant 1 : index
    %c0_98 = arith.constant 0 : index
    %91 = tpu.strided_load %arg20[%c1_97, %c0_98] {strides = array<i32: 4, 1>} : memref<8x80xf32, #tpu.memory_space<vmem>>, vector<2x80xf32>
    %c2_99 = arith.constant 2 : index
    %c0_100 = arith.constant 0 : index
    %92 = tpu.strided_load %arg20[%c2_99, %c0_100] {strides = array<i32: 4, 1>} : memref<8x80xf32, #tpu.memory_space<vmem>>, vector<2x80xf32>
    %c3_101 = arith.constant 3 : index
    %c0_102 = arith.constant 0 : index
    %93 = tpu.strided_load %arg20[%c3_101, %c0_102] {strides = array<i32: 4, 1>} : memref<8x80xf32, #tpu.memory_space<vmem>>, vector<2x80xf32>
    %94 = tpu.concatenate %90, %91, %92, %93 in 1 : vector<2x80xf32>, vector<2x80xf32>, vector<2x80xf32>, vector<2x80xf32> -> vector<2x320xf32>
    %c0_103 = arith.constant 0 : index
    %c0_104 = arith.constant 0 : index
    %95 = vector.load %arg10[%c0_103, %c0_104] : memref<320x256xbf16, #tpu.memory_space<vmem>>, vector<320x256xbf16>
    %96 = arith.truncf %94 : vector<2x320xf32> to vector<2x320xbf16>
    %cst_105 = arith.constant dense<0.000000e+00> : vector<2x256xf32>
    %97 = tpu.matmul %96, %95, %cst_105 {dimension_numbers = #tpu.dot_dimension_numbers<[1], [0], [0], [1], [0, 0, 1, 1], [], []>} : vector<2x320xbf16>, vector<320x256xbf16>, vector<2x256xf32> -> vector<2x256xf32>
    %c0_106 = arith.constant 0 : index
    %c0_107 = arith.constant 0 : index
    %98 = vector.load %arg11[%c0_106, %c0_107] : memref<1x256xf32, #tpu.memory_space<vmem>>, vector<1x256xf32>
    %99 = vector.broadcast %98 : vector<1x256xf32> to vector<2x256xf32>
    %100 = arith.addf %97, %99 : vector<2x256xf32>
    %cst_108 = arith.constant 0.000000e+00 : f32
    %101 = vector.broadcast %cst_108 : f32 to vector<2x256xf32>
    %102 = arith.maximumf %100, %101 : vector<2x256xf32>
    %c0_109 = arith.constant 0 : index
    %c0_110 = arith.constant 0 : index
    %103 = vector.load %arg12[%c0_109, %c0_110] : memref<256x128xbf16, #tpu.memory_space<vmem>>, vector<256x128xbf16>
    %104 = arith.truncf %102 : vector<2x256xf32> to vector<2x256xbf16>
    %cst_111 = arith.constant dense<0.000000e+00> : vector<2x128xf32>
    %105 = tpu.matmul %104, %103, %cst_111 {dimension_numbers = #tpu.dot_dimension_numbers<[1], [0], [0], [1], [0, 0, 1, 1], [], []>} : vector<2x256xbf16>, vector<256x128xbf16>, vector<2x128xf32> -> vector<2x128xf32>
    %c0_112 = arith.constant 0 : index
    %c0_113 = arith.constant 0 : index
    %106 = vector.load %arg13[%c0_112, %c0_113] : memref<1x128xf32, #tpu.memory_space<vmem>>, vector<1x128xf32>
    %107 = vector.broadcast %106 : vector<1x128xf32> to vector<2x128xf32>
    %108 = arith.addf %105, %107 : vector<2x128xf32>
    %cst_114 = arith.constant 0.000000e+00 : f32
    %109 = vector.broadcast %cst_114 : f32 to vector<2x128xf32>
    %110 = arith.maximumf %108, %109 : vector<2x128xf32>
    %c0_115 = arith.constant 0 : index
    %c0_116 = arith.constant 0 : index
    %111 = vector.load %arg14[%c0_115, %c0_116] : memref<128x64xbf16, #tpu.memory_space<vmem>>, vector<128x64xbf16>
    %112 = arith.truncf %110 : vector<2x128xf32> to vector<2x128xbf16>
    %cst_117 = arith.constant dense<0.000000e+00> : vector<2x64xf32>
    %113 = tpu.matmul %112, %111, %cst_117 {dimension_numbers = #tpu.dot_dimension_numbers<[1], [0], [0], [1], [0, 0, 1, 1], [], []>} : vector<2x128xbf16>, vector<128x64xbf16>, vector<2x64xf32> -> vector<2x64xf32>
    %c0_118 = arith.constant 0 : index
    %c0_119 = arith.constant 0 : index
    %114 = vector.load %arg15[%c0_118, %c0_119] : memref<1x64xf32, #tpu.memory_space<vmem>>, vector<1x64xf32>
    %115 = vector.broadcast %114 : vector<1x64xf32> to vector<2x64xf32>
    %116 = arith.addf %113, %115 : vector<2x64xf32>
    %cst_120 = arith.constant 0.000000e+00 : f32
    %117 = vector.broadcast %cst_120 : f32 to vector<2x64xf32>
    %118 = arith.maximumf %116, %117 : vector<2x64xf32>
    %c0_121 = arith.constant 0 : index
    %c0_122 = arith.constant 0 : index
    %119 = vector.load %arg16[%c0_121, %c0_122] : memref<64x10xbf16, #tpu.memory_space<vmem>>, vector<64x10xbf16>
    %120 = arith.truncf %118 : vector<2x64xf32> to vector<2x64xbf16>
    %cst_123 = arith.constant dense<0.000000e+00> : vector<2x10xf32>
    %121 = tpu.matmul %120, %119, %cst_123 {dimension_numbers = #tpu.dot_dimension_numbers<[1], [0], [0], [1], [0, 0, 1, 1], [], []>} : vector<2x64xbf16>, vector<64x10xbf16>, vector<2x10xf32> -> vector<2x10xf32>
    %c0_124 = arith.constant 0 : index
    %c0_125 = arith.constant 0 : index
    %122 = vector.load %arg17[%c0_124, %c0_125] : memref<1x10xf32, #tpu.memory_space<vmem>>, vector<1x10xf32>
    %123 = vector.broadcast %122 : vector<1x10xf32> to vector<2x10xf32>
    %124 = arith.addf %121, %123 : vector<2x10xf32>
    %c0_126 = arith.constant 0 : index
    %c0_127 = arith.constant 0 : index
    %125 = vector.load %arg18[%c0_126, %c0_127] : memref<2x10xf32, #tpu.memory_space<vmem>>, vector<2x10xf32>
    tpu.vector_store %arg18[%c0_126, %c0_127], %124 {strides = array<i32>} : memref<2x10xf32, #tpu.memory_space<vmem>>, vector<2x10xf32>,
    return
  }
  func.func @transform_0(%arg0: i32) -> (i32, i32) {
    %c0_i32 = arith.constant 0 : i32
    %c0_i32_0 = arith.constant 0 : i32
    return %arg0, %c0_i32 : i32, i32
  }
  func.func @transform_1(%arg0: i32) -> (i32, i32) {
    %c0_i32 = arith.constant 0 : i32
    %c0_i32_0 = arith.constant 0 : i32
    %c0_i32_1 = arith.constant 0 : i32
    return %c0_i32, %c0_i32_0 : i32, i32
  }
  func.func @transform_2(%arg0: i32) -> (i32, i32) {
    %c0_i32 = arith.constant 0 : i32
    %c0_i32_0 = arith.constant 0 : i32
    %c0_i32_1 = arith.constant 0 : i32
    return %c0_i32, %c0_i32_0 : i32, i32
  }
  func.func @transform_3(%arg0: i32) -> (i32, i32) {
    %c0_i32 = arith.constant 0 : i32
    %c0_i32_0 = arith.constant 0 : i32
    %c0_i32_1 = arith.constant 0 : i32
    return %c0_i32, %c0_i32_0 : i32, i32
  }
  func.func @transform_4(%arg0: i32) -> (i32, i32) {
    %c0_i32 = arith.constant 0 : i32
    %c0_i32_0 = arith.constant 0 : i32
    %c0_i32_1 = arith.constant 0 : i32
    return %c0_i32, %c0_i32_0 : i32, i32
  }
  func.func @transform_5(%arg0: i32) -> (i32, i32) {
    %c0_i32 = arith.constant 0 : i32
    %c0_i32_0 = arith.constant 0 : i32
    %c0_i32_1 = arith.constant 0 : i32
    return %c0_i32, %c0_i32_0 : i32, i32
  }
  func.func @transform_6(%arg0: i32) -> (i32, i32) {
    %c0_i32 = arith.constant 0 : i32
    %c0_i32_0 = arith.constant 0 : i32
    %c0_i32_1 = arith.constant 0 : i32
    return %c0_i32, %c0_i32_0 : i32, i32
  }
  func.func @transform_7(%arg0: i32) -> (i32, i32) {
    %c0_i32 = arith.constant 0 : i32
    %c0_i32_0 = arith.constant 0 : i32
    %c0_i32_1 = arith.constant 0 : i32
    return %c0_i32, %c0_i32_0 : i32, i32
  }
  func.func @transform_8(%arg0: i32) -> (i32, i32) {
    %c0_i32 = arith.constant 0 : i32
    %c0_i32_0 = arith.constant 0 : i32
    %c0_i32_1 = arith.constant 0 : i32
    return %c0_i32, %c0_i32_0 : i32, i32
  }
  func.func @transform_9(%arg0: i32) -> (i32, i32) {
    %c0_i32 = arith.constant 0 : i32
    %c0_i32_0 = arith.constant 0 : i32
    %c0_i32_1 = arith.constant 0 : i32
    return %c0_i32, %c0_i32_0 : i32, i32
  }
  func.func @transform_10(%arg0: i32) -> (i32, i32) {
    %c0_i32 = arith.constant 0 : i32
    %c0_i32_0 = arith.constant 0 : i32
    %c0_i32_1 = arith.constant 0 : i32
    return %c0_i32, %c0_i32_0 : i32, i32
  }
  func.func @transform_11(%arg0: i32) -> (i32, i32) {
    %c0_i32 = arith.constant 0 : i32
    %c0_i32_0 = arith.constant 0 : i32
    %c0_i32_1 = arith.constant 0 : i32
    return %c0_i32, %c0_i32_0 : i32, i32
  }
  func.func @transform_12(%arg0: i32) -> (i32, i32) {
    %c0_i32 = arith.constant 0 : i32
    %c0_i32_0 = arith.constant 0 : i32
    %c0_i32_1 = arith.constant 0 : i32
    return %c0_i32, %c0_i32_0 : i32, i32
  }
  func.func @transform_13(%arg0: i32) -> (i32, i32) {
    %c0_i32 = arith.constant 0 : i32
    %c0_i32_0 = arith.constant 0 : i32
    %c0_i32_1 = arith.constant 0 : i32
    return %c0_i32, %c0_i32_0 : i32, i32
  }
  func.func @transform_14(%arg0: i32) -> (i32, i32) {
    %c0_i32 = arith.constant 0 : i32
    %c0_i32_0 = arith.constant 0 : i32
    %c0_i32_1 = arith.constant 0 : i32
    return %c0_i32, %c0_i32_0 : i32, i32
  }
  func.func @transform_15(%arg0: i32) -> (i32, i32) {
    %c0_i32 = arith.constant 0 : i32
    %c0_i32_0 = arith.constant 0 : i32
    %c0_i32_1 = arith.constant 0 : i32
    return %c0_i32, %c0_i32_0 : i32, i32
  }
  func.func @transform_16(%arg0: i32) -> (i32, i32) {
    %c0_i32 = arith.constant 0 : i32
    %c0_i32_0 = arith.constant 0 : i32
    %c0_i32_1 = arith.constant 0 : i32
    return %c0_i32, %c0_i32_0 : i32, i32
  }
  func.func @transform_17(%arg0: i32) -> (i32, i32) {
    %c0_i32 = arith.constant 0 : i32
    %c0_i32_0 = arith.constant 0 : i32
    return %arg0, %c0_i32 : i32, i32
  }
}

</mosaic_0001>

<bundles_post_ra>
// kernel: simple_cnn_forward.1
= control target key start
LH: loop header
LB: loop body
LE: loop exit
PB: predicated region body
PF: predicated region fallthrough
CT: control target
= control target key end

     0   :  { %s4929_s0 = inlined_call_operand.vmem [shape: f32[56,28], index: 0, kind: input, shape index: {}]   ;;  %s4930_s1 = inlined_call_operand.vmem [shape: bf16[140,240], index: 1, kind: input, shape index: {}]   ;;  %s4931_s2 = inlined_call_operand.vmem [shape: f32[1,240], index: 2, kind: input, shape index: {}]   ;;  %s4932_s3 = inlined_call_operand.vmem [shape: bf16[240,120], index: 3, kind: input, shape index: {}]   ;;  %s4933_s4 = inlined_call_operand.vmem [shape: bf16[240,120], index: 4, kind: input, shape index: {}]   ;;  %s4934_s5 = inlined_call_operand.vmem [shape: bf16[600,160], index: 5, kind: input, shape index: {}]   ;;  %s4935_s6 = inlined_call_operand.vmem [shape: f32[1,160], index: 6, kind: input, shape index: {}]   ;;  %s4936_s7 = inlined_call_operand.vmem [shape: bf16[160,80], index: 7, kind: input, shape index: {}]   ;;  %s4937_s8 = inlined_call_operand.vmem [shape: bf16[160,80], index: 8, kind: input, shape index: {}]   ;;  %s4938_s9 = inlined_call_operand.vmem [shape: bf16[320,256], index: 9, kind: input, shape index: {}]   ;;  %s4939_s10 = inlined_call_operand.vmem [shape: f32[1,256], index: 10, kind: input, shape index: {}]   ;;  %s4940_s11 = inlined_call_operand.vmem [shape: bf16[256,128], index: 11, kind: input, shape index: {}]   ;;  %s4941_s12 = inlined_call_operand.vmem [shape: f32[1,128], index: 12, kind: input, shape index: {}]   ;;  %s4942_s13 = inlined_call_operand.vmem [shape: bf16[128,64], index: 13, kind: input, shape index: {}]   ;;  %s4943_s14 = inlined_call_operand.vmem [shape: f32[1,64], index: 14, kind: input, shape index: {}]   ;;  %s4944_s15 = inlined_call_operand.vmem [shape: bf16[64,10], index: 15, kind: input, shape index: {}]   ;;  %s4945_s16 = inlined_call_operand.vmem [shape: f32[1,10], index: 16, kind: input, shape index: {}]   ;;  %s4946_s17 = inlined_call_operand.hbm [shape: f32[2,10], index: 17, kind: output, shape index: {}]  }
   0x1   :  { %4979 = sst [smem:[#allocation33_spill]] %s4929_s0 }
   0x2   :  { %4980 = sst [smem:[#allocation34_spill]] %s4930_s1 }
   0x3   :  { %s4981_s26 = sld [smem:[#allocation33_spill]]  ;;  %s3525_s20 = smov 28   ;;  %vm313_vm0 = vcmask 1045504   ;;  %v4949_v55 = vmov 0  }
   0x4   :  { %s3526_s0 = smov 56   ;;  %s3527_s19 = smov 84  }
   0x5   :  { %s4982_s22 = sld [smem:[#allocation34_spill]]  ;;  %s3528_s28 = smov 112  }
   0x9   :  { %v2796_v0 = vld [vmem:[%s4981_s26 + $0x1e] ss:$2 sm:$0xff]  ;;  %v2798_v1 = vld [vmem:[%s4981_s26 + $0x1f] ss:$2 sm:$0xff] }
   0xa   :  { %v3637_v2 = vld [vmem:[%s4981_s26 + $0x1d] ss:$2 sm:$0xff]  ;;  %v2787_v4 = vld [vmem:[%s4981_s26 + $0x12] ss:$2 sm:$0xf]  ;;  %v3125_v6 = vpack.i.bf16 %v2798_v1, %v2796_v0 }
   0xb   :  { %v3120_v3 = vpack.i.bf16 %v2796_v0, %v3637_v2  ;;  %v3646_v5 = vld [vmem:[%s4981_s26 + $0x11] ss:$2 sm:$0xf]  ;;  %v2800_v8 = vld [vmem:[%s4981_s26 + $0x20] ss:$2 sm:$0xff] }
   0xc   :  { %v3130_v7 = vpack.i.bf16 %v2787_v4, %v3646_v5  ;;  %v3656_v9 = vld [vmem:[%s4981_s26 + $0x1] ss:$2 sm:$0xff]  ;;  %v2786_v10 = vld [vmem:[%s4981_s26 + $0x2] ss:$2 sm:$0xff]  ;;  %v3135_v11 = vpack.i.bf16 %v2800_v8, %v2798_v1  ;;  %v3225_v16 = vld [vmem:[%s4982_s22 + $0x74] ss:$8 sps:$4 sm:$0xff]  }
   0xd   :  { %3121 = vrot.lane.b32.xlu0 %v3120_v3, %s3525_s20  ;;  %v2789_v12 = vld [vmem:[%s4981_s26 + $0x13] ss:$2 sm:$0xf]  ;;  %v3140_v13 = vpack.i.bf16 %v2786_v10, %v3656_v9  ;;  %v2825_v14 = vld [vmem:[%s4981_s26 + $0x21] ss:$2 sm:$0xff]  ;;  %320 = vmatprep.subr.bf16.mxu0 %v3225_v16 }
   0xe   :  { %3131 = vrot.lane.b32.xlu1 %v3130_v7, %s3525_s20  ;;  %v3145_v15 = vpack.i.bf16 %v2789_v12, %v2787_v4  ;;  %v2788_v17 = vld [vmem:[%s4981_s26 + $0x3] ss:$2 sm:$0xff]  ;;  %v3150_v20 = vpack.i.bf16 %v2825_v14, %v2800_v8  ;;  %v2791_v21 = vld [vmem:[%s4981_s26 + $0x14] ss:$2 sm:$0xf]  ;;  %471 = vmatprep.subr.bf16.mxu1 %v3225_v16 }
   0xf   :  { %v3227_v18 = vld [vmem:[%s4982_s22 + $0x70] ss:$8 sps:$4 sm:$0xff]   ;;  %v3228_v19 = vld [vmem:[%s4982_s22 + $0x64] ss:$8 sps:$4 sm:$0xff]   ;;  %v3230_v22 = vld [vmem:[%s4982_s22 + $0x60] ss:$8 sps:$4 sm:$0xff]   ;;  %v3155_v23 = vpack.i.bf16 %v2788_v17, %v2786_v10  ;;  %v3160_v26 = vpack.i.bf16 %v2791_v21, %v2789_v12 }
  0x10   :  { %321 = vmatpush1.bf16.msra.mxu0 %v3227_v18  ;;  %v2790_v24 = vld [vmem:[%s4981_s26 + $0x4] ss:$2 sm:$0xff]  ;;  %472 = vmatpush1.bf16.msra.mxu1 %v3227_v18  ;;  %v3231_v25 = vld [vmem:[%s4982_s22 + $0x54] ss:$8 sps:$4 sm:$0xff]   ;;  %v2823_v30 = vld [vmem:[%s4981_s26 + $0x5] ss:$2 sm:$0xff] }
  0x11   :  { %3126 = vrot.lane.b32.xlu0 %v3125_v6, %s3526_s0  ;;  %322 = vmatprep.subr.bf16.mxu0 %v3228_v19  ;;  %v2824_v27 = vld [vmem:[%s4981_s26 + $0x15] ss:$2 sm:$0xf]  ;;  %v3165_v29 = vpack.i.bf16 %v2790_v24, %v2788_v17  ;;  %v2797_v31 = vld [vmem:[%s4981_s26 + $0x2e] ss:$2 sm:$0xf]  ;;  %v3175_v36 = vpack.i.bf16 %v2823_v30, %v2790_v24 }
  0x12   :  { %3136 = vrot.lane.b32.xlu1 %v3135_v11, %s3527_s19  ;;  %473 = vmatprep.subr.bf16.mxu1 %v3228_v19  ;;  %v3233_v28 = vld [vmem:[%s4982_s22 + $0x50] ss:$8 sps:$4 sm:$0xff]   ;;  %v3234_v32 = vld [vmem:[%s4982_s22 + $0x44] ss:$8 sps:$4 sm:$0xff]   ;;  %v3170_v33 = vpack.i.bf16 %v2824_v27, %v2791_v21  ;;  %v3236_v35 = vld [vmem:[%s4982_s22 + $0x40] ss:$8 sps:$4 sm:$0xff]  }
  0x13   :  { %v3718_v34 = vld [vmem:[%s4981_s26 + $0x2d] ss:$2 sm:$0xf]  ;;  %v3237_v38 = vld [vmem:[%s4982_s22 + $0x34] ss:$8 sps:$4 sm:$0xff]  }
  0x14   :  { %323 = vmatpush1.bf16.msra.mxu0 %v3230_v22  ;;  %474 = vmatpush1.bf16.msra.mxu1 %v3230_v22  ;;  %v2799_v37 = vld [vmem:[%s4981_s26 + $0x2f] ss:$2 sm:$0xf]  ;;  %v2801_v39 = vld [vmem:[%s4981_s26 + $0x30] ss:$2 sm:$0xf]  ;;  %v3180_v41 = vpack.i.bf16 %v2797_v31, %v3718_v34 }
  0x15   :  { %3141 = vrot.lane.b32.xlu0 %v3140_v13, %s3525_s20  ;;  %324 = vmatprep.subr.bf16.mxu0 %v3231_v25  ;;  %v3239_v40 = vld [vmem:[%s4982_s22 + $0x30] ss:$8 sps:$4 sm:$0xff]   ;;  %v3240_v43 = vld [vmem:[%s4982_s22 + $0x24] ss:$8 sps:$4 sm:$0xff]   ;;  %v3185_v44 = vpack.i.bf16 %v2799_v37, %v2797_v31  ;;  %v3190_v45 = vpack.i.bf16 %v2801_v39, %v2799_v37  ;;  %v3242_v46 = vld [vmem:[%s4982_s22 + $0x20] ss:$8 sps:$4 sm:$0xff]  }
  0x16   :  { %3146 = vrot.lane.b32.xlu1 %v3145_v15, %s3526_s0  ;;  %475 = vmatprep.subr.bf16.mxu1 %v3231_v25  ;;  %v2826_v42 = vld [vmem:[%s4981_s26 + $0x31] ss:$2 sm:$0xf]  ;;  %v3246_v50 = vld [vmem:[%s4982_s22 + $0x4] ss:$8 sps:$4 sm:$0xff]  }
  0x17   :  { %v3195_v47 = vpack.i.bf16 %v2826_v42, %v2801_v39  ;;  %v3243_v48 = vld [vmem:[%s4982_s22 + $0x14] ss:$8 sps:$4 sm:$0xff]   ;;  %v3245_v49 = vld [vmem:[%s4982_s22 + $0x10] ss:$8 sps:$4 sm:$0xff]   ;;  %v3248_v51 = vld [vmem:[%s4982_s22] ss:$8 sps:$4 sm:$0xff]  }
  0x18   :  { %325 = vmatpush1.bf16.msra.mxu0 %v3233_v28  ;;  %476 = vmatpush1.bf16.msra.mxu1 %v3233_v28  ;;  %v3249_v52 = vld [vmem:[%s4982_s22 + $0x84] ss:$8 sps:$4 sm:$0x3f]   ;;  %v3251_v53 = vld [vmem:[%s4982_s22 + $0x80] ss:$8 sps:$4 sm:$0x3f]  }
  0x19   :  { %3151 = vrot.lane.b32.xlu0 %v3150_v20, %s3528_s28  ;;  %326 = vmatprep.subr.bf16.mxu0 %v3234_v32  ;;  %v315_v54 = vsel %vm313_vm0, %v3251_v53, 0 }
  0x1a   :  { %3156 = vrot.lane.b32.xlu1 %v3155_v23, %s3526_s0  ;;  %477 = vmatprep.subr.bf16.mxu1 %v3234_v32 }
  0x1c   :  { %327 = vmatpush1.bf16.msra.mxu0 %v3236_v35  ;;  %478 = vmatpush1.bf16.msra.mxu1 %v3236_v35 }
  0x1d   :  { %3161 = vrot.lane.b32.xlu0 %v3160_v26, %s3527_s19  ;;  %328 = vmatprep.subr.bf16.mxu0 %v3237_v38 }
  0x1e   :  { %3166 = vrot.lane.b32.xlu1 %v3165_v29, %s3527_s19  ;;  %479 = vmatprep.subr.bf16.mxu1 %v3237_v38 }
  0x20   :  { %329 = vmatpush1.bf16.msra.mxu0 %v3239_v40  ;;  %480 = vmatpush1.bf16.msra.mxu1 %v3239_v40 }
  0x21   :  { %3171 = vrot.lane.b32.xlu0 %v3170_v33, %s3528_s28  ;;  %330 = vmatprep.subr.bf16.mxu0 %v3240_v43 }
  0x22   :  { %3176 = vrot.lane.b32.xlu1 %v3175_v36, %s3528_s28  ;;  %481 = vmatprep.subr.bf16.mxu1 %v3240_v43 }
  0x24   :  { %331 = vmatpush1.bf16.msra.mxu0 %v3242_v46  ;;  %482 = vmatpush1.bf16.msra.mxu1 %v3242_v46 }
  0x25   :  { %3181 = vrot.lane.b32.xlu0 %v3180_v41, %s3525_s20  ;;  %332 = vmatprep.subr.bf16.mxu0 %v3243_v48 }
  0x26   :  { %3186 = vrot.lane.b32.xlu1 %v3185_v44, %s3526_s0  ;;  %483 = vmatprep.subr.bf16.mxu1 %v3243_v48 }
  0x28   :  { %333 = vmatpush1.bf16.msra.mxu0 %v3245_v49  ;;  %484 = vmatpush1.bf16.msra.mxu1 %v3245_v49 }
  0x29   :  { %3191 = vrot.lane.b32.xlu0 %v3190_v45, %s3527_s19  ;;  %334 = vmatprep.subr.bf16.mxu0 %v3246_v50 }
  0x2a   :  { %3196 = vrot.lane.b32.xlu1 %v3195_v47, %s3528_s28  ;;  %485 = vmatprep.subr.bf16.mxu1 %v3246_v50 }
  0x2c   :  { %335 = vmatpush1.bf16.msra.mxu0 %v3248_v51  ;;  %486 = vmatpush1.bf16.msra.mxu1 %v3248_v51 }
  0x2d   :  { %2820 = vmatprep.subr.msk.bf16.mxu0 %vm313_vm0, %v3249_v52  ;;  %2827 = vmatprep.subr.msk.bf16.mxu1 %vm313_vm0, %v3249_v52 }
  0x30   :  { %351 = vmatpush2.bf16.msra.mxu0 %v315_v54  ;;  %502 = vmatpush2.bf16.msra.mxu1 %v315_v54 }
  0x31   :  { %682 = vmatprep.subr.bf16.mxu0 %v4949_v55  ;;  %850 = vmatprep.subr.bf16.mxu1 %v4949_v55 }
  0x7f   :  { %v3122_v56 = vpop.permute.xlu0 %3121 }
  0x80   :  { %v3132_v57 = vpop.permute.xlu1 %3131 }
  0x81   :  { %22 = vsyncpa [#allocation5], 0  ;;  %v3124_v60 = vunpack.i.h.bf16 %v3122_v56  ;;  %vm109_vm1 = vcmask 228352   ;;  %v3123_v61 = vunpack.i.l.bf16 %v3122_v56  ;;  %v2792_v63 = vld [vmem:[%s4981_s26 + $0x1c] ss:$2 sm:$0xff]  ;;  %vm112_vm2 = vcmask 457728  }
  0x82   :  { %vm115_vm3 = vcmask 687104   ;;  %v3134_v7 = vunpack.i.h.bf16 %v3132_v57  ;;  %v3133_v8 = vunpack.i.l.bf16 %v3132_v57  ;;  %v2783_v12 = vld [vmem:[%s4981_s26 + $0x10] ss:$2 sm:$0xf]  ;;  %vm118_vm4 = vcmask 916480   ;;  %s3531_s24 = smov 96  }
  0x83   :  { %v3127_v58 = vpop.permute.xlu0 %3126  ;;  %v439_v4 = vsel %vm109_vm1, %v3637_v2, %v3124_v60  ;;  %v173_v6 = vsel %vm109_vm1, %v2792_v63, %v3123_v61  ;;  %v58_v22 = vld [vmem:[%s4981_s26] ss:$2 sm:$0xff]  ;;  %vm183_vm5 = vcmask 1043456   ;;  %vm306_vm6 = vcmask 97280   ;;  %s3532_s25 = smov 104   ;;  %s3537_s23 = smov [#allocation4]  }
  0x84   :  { %v3137_v59 = vpop.permute.xlu1 %3136  ;;  %v3129_v0 = vunpack.i.h.bf16 %v3127_v58  ;;  %v3128_v1 = vunpack.i.l.bf16 %v3127_v58  ;;  %v402_v23 = vsel %vm109_vm1, %v3646_v5, %v3134_v7  ;;  %v111_v24 = vsel %vm109_vm1, %v2783_v12, %v3133_v8 }
  0x85   :  { %v3139_v10 = vunpack.i.h.bf16 %v3137_v59  ;;  %v3138_v14 = vunpack.i.l.bf16 %v3137_v59  ;;  %v2793_v59 = vld [vmem:[%s4981_s26 + $0x2c] ss:$2 sm:$0xf]  ;;  %vm901_vm7 = vcmask 982016   ;;  %s3530_s26 = smov 120   ;;  %vm932_vm8 = vcmask 850944  }
  0x86   :  { %v441_v13 = vsel %vm112_vm2, %v439_v4, %v3129_v0  ;;  %v175_v17 = vsel %vm112_vm2, %v173_v6, %v3128_v1  ;;  %vm934_vm9 = vcmask 785408   ;;  %vm1440_vm10 = vcmask 719872  }
  0x87   :  { %v3142_v62 = vpop.permute.xlu0 %3141  ;;  %v443_v25 = vsel %vm115_vm3, %v441_v13, %v3139_v10  ;;  %v177_v28 = vsel %vm115_vm3, %v175_v17, %v3138_v14  ;;  %vm1861_vm11 = vcmask 261120   ;;  %vm2026_vm12 = vcmask 654336  }
  0x88   :  { %v3147_v3 = vpop.permute.xlu1 %3146  ;;  %v3144_v15 = vunpack.i.h.bf16 %v3142_v62  ;;  %v3143_v18 = vunpack.i.l.bf16 %v3142_v62  ;;  %vm2305_vm13 = vcmask 523264   ;;  %vm3536_vm14 = vmmov 0  }
  0x89   :  { %v3149_v20 = vunpack.i.h.bf16 %v3147_v3  ;;  %v3148_v21 = vunpack.i.l.bf16 %v3147_v3  ;;  %vm2767_vm15 = vcmask 74752  }
  0x8a   :  { %v401_v29 = vsel %vm109_vm1, %v3656_v9, %v3144_v15  ;;  %v110_v32 = vsel %vm109_vm1, %v58_v22, %v3143_v18  ;;  %v3252_v15 = vld [vmem:[%s4932_s3 + $0x38] sm:$0xff]  }
  0x8b   :  { %v3152_v11 = vpop.permute.xlu0 %3151  ;;  %v114_v37 = vsel %vm112_vm2, %v111_v24, %v3148_v21  ;;  %v404_v38 = vsel %vm112_vm2, %v402_v23, %v3149_v20 }
  0x8c   :  { %v3154_v16 = vunpack.i.h.bf16 %v3152_v11  ;;  %v3157_v2 = vpop.permute.xlu1 %3156  ;;  %v3153_v19 = vunpack.i.l.bf16 %v3152_v11 }
  0x8d   :  { %v3158_v26 = vunpack.i.l.bf16 %v3157_v2  ;;  %v3159_v30 = vunpack.i.h.bf16 %v3157_v2 }
  0x8e   :  { %v3794_v31 = vsel %vm118_vm4, %v443_v25, %v3154_v16  ;;  %v3798_v5 = vsel %vm118_vm4, %v177_v28, %v3153_v19  ;;  %v3804_v42 = vrot.slane %v3154_v16, 4  ;;  %v3806_v43 = vrot.slane %v3153_v19, 4  ;;  %v3253_v16 = vld [vmem:[%s4933_s4 + $0x38] sm:$0xff]   ;;  %v3255_v28 = vld [vmem:[%s4933_s4 + $0x30] sm:$0xff]  }
  0x8f   :  { %v3162_v27 = vpop.permute.xlu0 %3161  ;;  %v113_v9 = vsel %vm112_vm2, %v110_v32, %v3158_v26  ;;  %v449_v41 = vrot.slane %v3794_v31, 4  ;;  %v403_v45 = vsel %vm112_vm2, %v401_v29, %v3159_v30  ;;  %v184_v46 = vrot.slane %v3798_v5, 4  ;;  %v3258_v31 = vld [vmem:[%s4932_s3 + $0x20] sm:$0xff]  }
  0x90   :  { %v3167_v33 = vpop.permute.xlu1 %3166  ;;  %v3164_v35 = vunpack.i.h.bf16 %v3162_v27  ;;  %v3163_v36 = vunpack.i.l.bf16 %v3162_v27  ;;  %v3254_v27 = vld [vmem:[%s4932_s3 + $0x30] sm:$0xff]   ;;  %v3259_v5 = vld [vmem:[%s4933_s4 + $0x20] sm:$0xff]  }
  0x91   :  { %v3169_v39 = vunpack.i.h.bf16 %v3167_v33  ;;  %v3168_v40 = vunpack.i.l.bf16 %v3167_v33 }
  0x92   :  { %v406_v51 = vsel %vm115_vm3, %v404_v38, %v3164_v35  ;;  %v117_v52 = vsel %vm115_vm3, %v114_v37, %v3163_v36 }
  0x93   :  { %v3172_v44 = vpop.permute.xlu0 %3171  ;;  %v116_v49 = vsel %vm115_vm3, %v113_v9, %v3168_v40  ;;  %v405_v50 = vsel %vm115_vm3, %v403_v45, %v3169_v39 }
  0x94   :  { %v3174_v47 = vunpack.i.h.bf16 %v3172_v44  ;;  %v3173_v48 = vunpack.i.l.bf16 %v3172_v44  ;;  %v3177_v53 = vpop.permute.xlu1 %3176 }
  0x95   :  { %v3179_v54 = vunpack.i.h.bf16 %v3177_v53  ;;  %v3178_v56 = vunpack.i.l.bf16 %v3177_v53  ;;  %v3267_v53 = vld [vmem:[%s4933_s4] sm:$0xff]  }
  0x96   :  { %v120_v57 = vsel %vm118_vm4, %v117_v52, %v3173_v48  ;;  %v408_v58 = vsel %vm118_vm4, %v406_v51, %v3174_v47  ;;  %v195_v61 = vsel %vm183_vm5, %v3173_v48, %v3806_v43  ;;  %v460_v62 = vsel %vm183_vm5, %v3174_v47, %v3804_v42  ;;  %v3262_v48 = vld [vmem:[%s4932_s3 + $0x10] sm:$0xff]   ;;  %v3265_v51 = vld [vmem:[%s4933_s4 + $0x8] sm:$0xff]   ;;  %v3266_v52 = vld [vmem:[%s4932_s3] sm:$0xff]  }
  0x97   :  { %v3182_v60 = vpop.permute.xlu0 %3181  ;;  %v194_v63 = vsel %vm183_vm5, %v120_v57, %v184_v46  ;;  %v459_v0 = vsel %vm183_vm5, %v408_v58, %v449_v41  ;;  %v215_v4 = vpack.c.bf16 %v195_v61, %v3178_v56  ;;  %v462_v6 = vpack.c.bf16 %v460_v62, %v3179_v54  ;;  %v3270_v57 = vld [vmem:[%s4932_s3 + $0x68] sm:$0xff]   ;;  %v3274_v61 = vld [vmem:[%s4932_s3 + $0x58] sm:$0xff]  }
  0x98   :  { %v3184_v1 = vunpack.i.h.bf16 %v3182_v60  ;;  %v3183_v3 = vunpack.i.l.bf16 %v3182_v60  ;;  %v3187_v7 = vpop.permute.xlu1 %3186  ;;  %v119_v8 = vsel %vm118_vm4, %v116_v49, %v3178_v56  ;;  %v407_v10 = vsel %vm118_vm4, %v405_v50, %v3179_v54  ;;  %v3263_v49 = vld [vmem:[%s4933_s4 + $0x10] sm:$0xff]   ;;  %v3264_v50 = vld [vmem:[%s4932_s3 + $0x8] sm:$0xff]   ;;  %v3273_v60 = vld [vmem:[%s4933_s4 + $0x60] sm:$0xff]  }
  0x99   :  { %v3189_v11 = vunpack.i.h.bf16 %v3187_v7  ;;  %v3188_v12 = vunpack.i.l.bf16 %v3187_v7  ;;  %2821 = vmatprep.mubr.msk.bf16.mxu0 %vm306_vm6, %v215_v4  ;;  %2828 = vmatprep.mubr.msk.bf16.mxu1 %vm306_vm6, %v462_v6  ;;  %v214_v17 = vpack.c.bf16 %v194_v63, %v119_v8  ;;  %v461_v18 = vpack.c.bf16 %v459_v0, %v407_v10  ;;  %v3268_v54 = vld [vmem:[%s4932_s3 + $0x70] sm:$0xff]   ;;  %v3271_v58 = vld [vmem:[%s4933_s4 + $0x68] sm:$0xff]   ;;  %v3275_v62 = vld [vmem:[%s4933_s4 + $0x58] sm:$0xff]  }
  0x9a   :  { %v440_v13 = vsel %vm109_vm1, %v3718_v34, %v3184_v1  ;;  %v174_v14 = vsel %vm109_vm1, %v2793_v59, %v3183_v3  ;;  %v3269_v56 = vld [vmem:[%s4933_s4 + $0x70] sm:$0xff]   ;;  %v3272_v59 = vld [vmem:[%s4932_s3 + $0x60] sm:$0xff]   ;;  %v3278_v1 = vld [vmem:[%s4932_s3 + $0x48] sm:$0xff]   ;;  %v530_v7 = vlaneseq }
  0x9b   :  { %v3192_v2 = vpop.permute.xlu0 %3191  ;;  %v176_v34 = vsel %vm112_vm2, %v174_v14, %v3188_v12  ;;  %v442_v21 = vsel %vm112_vm2, %v440_v13, %v3189_v11  ;;  %353 = vmatmul.mubr.bf16.vlgmr.msra.gmra.mxu0 %v214_v17  ;;  %504 = vmatmul.mubr.bf16.vlgmr.msra.gmra.mxu1 %v461_v18  ;;  %v3276_v63 = vld [vmem:[%s4932_s3 + $0x50] sm:$0xff]   ;;  %v3279_v3 = vld [vmem:[%s4933_s4 + $0x48] sm:$0xff]   ;;  %v3280_v4 = vld [vmem:[%s4932_s3 + $0x40] sm:$0xff]  }
  0x9c   :  { %v3194_v19 = vunpack.i.h.bf16 %v3192_v2  ;;  %v3193_v20 = vunpack.i.l.bf16 %v3192_v2  ;;  %v3197_v22 = vpop.permute.xlu1 %3196  ;;  %683 = vmatpush1.bf16.msra.mxu0 %v3252_v15  ;;  %851 = vmatpush1.bf16.msra.mxu1 %v3253_v16  ;;  %v3277_v0 = vld [vmem:[%s4933_s4 + $0x50] sm:$0xff]   ;;  %v3281_v6 = vld [vmem:[%s4933_s4 + $0x40] sm:$0xff]   ;;  %v531_v8 = vshrl.u32 %v530_v7, 7 }
  0x9d   :  { %v3199_v23 = vunpack.i.h.bf16 %v3197_v22  ;;  %v3198_v24 = vunpack.i.l.bf16 %v3197_v22  ;;  %684 = vmatprep.subr.bf16.mxu0 %v4949_v55  ;;  %852 = vmatprep.subr.bf16.mxu1 %v4949_v55  ;;  %v528_v14 = vld [vmem:[%s4931_s2] sm:$0x3]  ;;  %v4093_v7 = vld [vmem:[%s4934_s5 + $0x30] ss:$8 sps:$4 sm:$0xff]  }
  0x9e   :  { %v178_v25 = vsel %vm115_vm3, %v176_v34, %v3193_v20  ;;  %v444_v26 = vsel %vm115_vm3, %v442_v21, %v3194_v19  ;;  %v3972_v10 = vsub.s32 1, %v531_v8  ;;  %v3974_v13 = vsub.s32 0, %v531_v8  ;;  %v4100_v8 = vld [vmem:[%s4934_s5 + $0x24] ss:$8 sps:$4 sm:$0xff]  }
  0x9f   :  { %v453_v29 = vrot.slane %v3199_v23, 4  ;;  %v188_v30 = vrot.slane %v3198_v24, 4  ;;  %v180_v32 = vsel %vm118_vm4, %v178_v25, %v3198_v24  ;;  %v446_v33 = vsel %vm118_vm4, %v444_v26, %v3199_v23 }
  0xa0   :  { %v186_v35 = vrot.slane %v180_v32, 4  ;;  %v451_v36 = vrot.slane %v446_v33, 4  ;;  %685 = vmatpush1.bf16.msra.mxu0 %v3254_v27  ;;  %853 = vmatpush1.bf16.msra.mxu1 %v3255_v28  ;;  %4983 = vst [vmem:[#allocation7_spill] sm:$0xff] %v3972_v10  ;;  %4984 = vst [vmem:[#allocation8_spill] sm:$0xff] %v3974_v13  ;;  %v537_v18 = vrot.slane %v528_v14, %v3972_v10 }
  0xa1   :  { %v189_v37 = vsel %vm183_vm5, %v3806_v43, %v188_v30  ;;  %v454_v38 = vsel %vm183_vm5, %v3804_v42, %v453_v29  ;;  %686 = vmatprep.subr.bf16.mxu0 %v4949_v55  ;;  %v3256_v43 = vld [vmem:[%s4932_s3 + $0x28] sm:$0xff]   ;;  %854 = vmatprep.subr.bf16.mxu1 %v4949_v55  ;;  %v533_v19 = vrot.slane %v528_v14, %v3974_v13 }
  0xa2   :  { %v217_v39 = vpack.c.bf16 %v189_v37, %v189_v37  ;;  %v464_v40 = vpack.c.bf16 %v454_v38, %v454_v38  ;;  %v187_v9 = vsel %vm183_vm5, %v184_v46, %v186_v35  ;;  %v452_v44 = vsel %vm183_vm5, %v449_v41, %v451_v36  ;;  %v3257_v42 = vld [vmem:[%s4933_s4 + $0x28] sm:$0xff]   ;;  %v3260_v41 = vld [vmem:[%s4932_s3 + $0x18] sm:$0xff]  }
  0xa3   :  { %v216_v45 = vpack.c.bf16 %v187_v9, %v187_v9  ;;  %v463_v47 = vpack.c.bf16 %v452_v44, %v452_v44  ;;  %v3261_v46 = vld [vmem:[%s4933_s4 + $0x18] sm:$0xff]   ;;  %v4117_v14 = vld [vmem:[%s4934_s5 + $0x20] ss:$8 sps:$4 sm:$0xff]  }
  0xa4   :  { %2822 = vmatprep.mubr.msk.bf16.mxu0 %vm306_vm6, %v217_v39  ;;  %2829 = vmatprep.mubr.msk.bf16.mxu1 %vm306_vm6, %v464_v40 }
  0xa5   :  { %363 = vmatmul.mubr.bf16.gmra.mxu0 %v216_v45  ;;  %514 = vmatmul.mubr.bf16.gmra.mxu1 %v463_v47 }
  0xa6   :  { %687 = vmatpush1.bf16.msra.mxu0 %v3256_v43  ;;  %855 = vmatpush1.bf16.msra.mxu1 %v3257_v42 }
  0xa7   :  { %688 = vmatprep.subr.bf16.mxu0 %v4949_v55  ;;  %856 = vmatprep.subr.bf16.mxu1 %v4949_v55 }
  0xaa   :  { %689 = vmatpush1.bf16.msra.mxu0 %v3258_v31  ;;  %857 = vmatpush1.bf16.msra.mxu1 %v3259_v5 }
  0xab   :  { %690 = vmatprep.subr.bf16.mxu0 %v4949_v55  ;;  %858 = vmatprep.subr.bf16.mxu1 %v4949_v55 }
  0xae   :  { %691 = vmatpush1.bf16.msra.mxu0 %v3260_v41  ;;  %859 = vmatpush1.bf16.msra.mxu1 %v3261_v46 }
  0xaf   :  { %692 = vmatprep.subr.bf16.mxu0 %v4949_v55  ;;  %860 = vmatprep.subr.bf16.mxu1 %v4949_v55 }
  0xb2   :  { %693 = vmatpush1.bf16.msra.mxu0 %v3262_v48  ;;  %861 = vmatpush1.bf16.msra.mxu1 %v3263_v49 }
  0xb3   :  { %694 = vmatprep.subr.bf16.mxu0 %v4949_v55  ;;  %862 = vmatprep.subr.bf16.mxu1 %v4949_v55 }
  0xb6   :  { %695 = vmatpush1.bf16.msra.mxu0 %v3264_v50  ;;  %863 = vmatpush1.bf16.msra.mxu1 %v3265_v51  ;;  %v3988_v50 = vld [vmem:[%s4934_s5 + $0x70] ss:$8 sps:$4 sm:$0xff]   ;;  %v3993_v51 = vld [vmem:[%s4934_s5 + $0x74] ss:$8 sps:$4 sm:$0xff]  }
  0xb7   :  { %696 = vmatprep.subr.bf16.mxu0 %v4949_v55  ;;  %864 = vmatprep.subr.bf16.mxu1 %v4949_v55 }
  0xba   :  { %697 = vmatpush1.bf16.msra.mxu0 %v3266_v52  ;;  %865 = vmatpush1.bf16.msra.mxu1 %v3267_v53  ;;  %v3998_v52 = vld [vmem:[%s4934_s5 + $0x64] ss:$8 sps:$4 sm:$0xff]   ;;  %v4003_v53 = vld [vmem:[%s4934_s5 + $0x170] ss:$8 sps:$4 sm:$0xff]  }
  0xbb   :  { %700 = vmatprep.subr.bf16.mxu0 %v4949_v55  ;;  %868 = vmatprep.subr.bf16.mxu1 %v4949_v55 }
  0xbe   :  { %701 = vmatpush2.bf16.msra.mxu0 %v3268_v54  ;;  %869 = vmatpush2.bf16.msra.mxu1 %v3269_v56  ;;  %v4008_v54 = vld [vmem:[%s4934_s5 + $0x174] ss:$8 sps:$4 sm:$0xff]   ;;  %v4015_v56 = vld [vmem:[%s4934_s5 + $0x60] ss:$8 sps:$4 sm:$0xff]  }
  0xbf   :  { %702 = vmatprep.subr.bf16.mxu0 %v4949_v55  ;;  %870 = vmatprep.subr.bf16.mxu1 %v4949_v55 }
  0xc2   :  { %703 = vmatpush2.bf16.msra.mxu0 %v3270_v57  ;;  %871 = vmatpush2.bf16.msra.mxu1 %v3271_v58  ;;  %v4021_v57 = vld [vmem:[%s4934_s5 + $0x164] ss:$8 sps:$4 sm:$0xff]   ;;  %v4028_v58 = vld [vmem:[%s4934_s5 + $0x54] ss:$8 sps:$4 sm:$0xff]  }
  0xc3   :  { %704 = vmatprep.subr.bf16.mxu0 %v4949_v55  ;;  %872 = vmatprep.subr.bf16.mxu1 %v4949_v55 }
  0xc6   :  { %705 = vmatpush2.bf16.msra.mxu0 %v3272_v59  ;;  %873 = vmatpush2.bf16.msra.mxu1 %v3273_v60  ;;  %v4033_v59 = vld [vmem:[%s4934_s5 + $0x160] ss:$8 sps:$4 sm:$0xff]   ;;  %v4039_v60 = vld [vmem:[%s4934_s5 + $0x154] ss:$8 sps:$4 sm:$0xff]  }
  0xc7   :  { %706 = vmatprep.subr.bf16.mxu0 %v4949_v55  ;;  %874 = vmatprep.subr.bf16.mxu1 %v4949_v55 }
  0xca   :  { %707 = vmatpush2.bf16.msra.mxu0 %v3274_v61  ;;  %875 = vmatpush2.bf16.msra.mxu1 %v3275_v62  ;;  %v4045_v61 = vld [vmem:[%s4934_s5 + $0x50] ss:$8 sps:$4 sm:$0xff]   ;;  %v4052_v62 = vld [vmem:[%s4934_s5 + $0x44] ss:$8 sps:$4 sm:$0xff]  }
  0xcb   :  { %708 = vmatprep.subr.bf16.mxu0 %v4949_v55  ;;  %876 = vmatprep.subr.bf16.mxu1 %v4949_v55 }
  0xce   :  { %709 = vmatpush2.bf16.msra.mxu0 %v3276_v63  ;;  %877 = vmatpush2.bf16.msra.mxu1 %v3277_v0  ;;  %v4057_v63 = vld [vmem:[%s4934_s5 + $0x150] ss:$8 sps:$4 sm:$0xff]   ;;  %v4063_v0 = vld [vmem:[%s4934_s5 + $0x144] ss:$8 sps:$4 sm:$0xff]  }
  0xcf   :  { %710 = vmatprep.subr.bf16.mxu0 %v4949_v55  ;;  %878 = vmatprep.subr.bf16.mxu1 %v4949_v55 }
  0xd2   :  { %711 = vmatpush2.bf16.msra.mxu0 %v3278_v1  ;;  %879 = vmatpush2.bf16.msra.mxu1 %v3279_v3  ;;  %v4069_v1 = vld [vmem:[%s4934_s5 + $0x40] ss:$8 sps:$4 sm:$0xff]   ;;  %v4076_v3 = vld [vmem:[%s4934_s5 + $0x34] ss:$8 sps:$4 sm:$0xff]  }
  0xd3   :  { %712 = vmatprep.subr.bf16.mxu0 %v4949_v55  ;;  %880 = vmatprep.subr.bf16.mxu1 %v4949_v55 }
  0xd6   :  { %713 = vmatpush2.bf16.msra.mxu0 %v3280_v4  ;;  %881 = vmatpush2.bf16.msra.mxu1 %v3281_v6  ;;  %v4081_v4 = vld [vmem:[%s4934_s5 + $0x140] ss:$8 sps:$4 sm:$0xff]   ;;  %v4087_v6 = vld [vmem:[%s4934_s5 + $0x134] ss:$8 sps:$4 sm:$0xff]  }
  0xd7   :  { %1450 = vmatprep.subr.bf16.mxu0 %v3993_v51  ;;  %1491 = vmatprep.subr.bf16.mxu1 %v4008_v54 }
 0x15b   :  { %v354_v11 = vpop.f32.mrf.mxu0  ;;  %v505_v12 = vpop.f32.mrf.mxu1 }
 0x15c   :  { %v522_v2 = vmax.f32 %v354_v11, %v505_v12  ;;  %v4105_v11 = vld [vmem:[%s4934_s5 + $0x130] ss:$8 sps:$4 sm:$0xff]   ;;  %v4111_v12 = vld [vmem:[%s4934_s5 + $0x124] ss:$8 sps:$4 sm:$0xff]  }
 0x15d   :  { %v356_v15 = vpop.f32.mrf.mxu0  ;;  %v507_v16 = vpop.f32.mrf.mxu1 }
 0x15e   :  { %v523_v17 = vmax.f32 %v356_v15, %v507_v16  ;;  %v540_v27 = vadd.f32 %v533_v19, %v522_v2  ;;  %v4124_v15 = vld [vmem:[%s4934_s5 + $0x14] ss:$8 sps:$4 sm:$0xff]   ;;  %v4129_v16 = vld [vmem:[%s4934_s5 + $0x120] ss:$8 sps:$4 sm:$0xff]   ;;  %v4148_v2 = vld [vmem:[%s4934_s5 + $0x4] ss:$8 sps:$4 sm:$0xff]  }
 0x15f   :  { %v358_v20 = vpop.f32.mrf.mxu0  ;;  %v509_v34 = vpop.f32.mrf.mxu1 }
 0x160   :  { %v524_v21 = vmax.f32 %v358_v20, %v509_v34  ;;  %v541_v24 = vadd.f32 %v537_v18, %v523_v17  ;;  %v546_v39 = vmax.f32 %v540_v27, 0.0  ;;  %v4135_v17 = vld [vmem:[%s4934_s5 + $0x114] ss:$8 sps:$4 sm:$0xff]   ;;  %v4159_v20 = vld [vmem:[%s4934_s5 + $0x104] ss:$8 sps:$4 sm:$0xff]  }
 0x161   :  { %v360_v22 = vpop.f32.mrf.mxu0  ;;  %v511_v23 = vpop.f32.mrf.mxu1  ;;  %v4165_v34 = vld [vmem:[%s4934_s5] ss:$8 sps:$4 sm:$0xff]   ;;  %v4207_v27 = vld [vmem:[%s4934_s5 + $0x1e4] ss:$8 sps:$4 sm:$0xff]  }
 0x162   :  { %v542_v25 = vadd.f32 %v533_v19, %v524_v21  ;;  %v525_v26 = vmax.f32 %v360_v22, %v511_v23  ;;  %v547_v35 = vmax.f32 %v541_v24, 0.0  ;;  %v4172_v21 = vld [vmem:[%s4934_s5 + $0xf4] ss:$8 sps:$4 sm:$0xff]   ;;  %v4177_v22 = vld [vmem:[%s4934_s5 + $0x100] ss:$8 sps:$4 sm:$0xff]   ;;  %4987 = vst [vmem:[#allocation11_spill] sm:$0xff] %v4207_v27 }
 0x163   :  { %v4183_v23 = vld [vmem:[%s4934_s5 + $0x1f4] ss:$8 sps:$4 sm:$0xff]   ;;  %v4189_v24 = vld [vmem:[%s4934_s5 + $0xf0] ss:$8 sps:$4 sm:$0xff]  }
 0x164   :  { %v543_v28 = vadd.f32 %v537_v18, %v525_v26  ;;  %v548_v32 = vmax.f32 %v542_v25, 0.0  ;;  %4985 = vst [vmem:[#allocation9_spill] sm:$0xff] %v4183_v23  ;;  %v4196_v25 = vld [vmem:[%s4934_s5 + $0xe4] ss:$8 sps:$4 sm:$0xff]   ;;  %v4201_v26 = vld [vmem:[%s4934_s5 + $0x1f0] ss:$8 sps:$4 sm:$0xff]  }
 0x165   :  { %v364_v29 = vpop.f32.mrf.mxu0  ;;  %v515_v30 = vpop.f32.mrf.mxu1  ;;  %4986 = vst [vmem:[#allocation10_spill] sm:$0xff] %v4201_v26 }
 0x166   :  { %v526_v33 = vmax.f32 %v364_v29, %v515_v30  ;;  %v549_v36 = vmax.f32 %v543_v28, 0.0  ;;  %v552_v42 = vpack.c.bf16 %v548_v32, %v546_v39  ;;  %v4213_v28 = vld [vmem:[%s4934_s5 + $0xe0] ss:$8 sps:$4 sm:$0xff]   ;;  %v4220_v29 = vld [vmem:[%s4934_s5 + $0xd4] ss:$8 sps:$4 sm:$0xff]  }
 0x167   :  { %v366_v37 = vpop.f32.mrf.mxu0  ;;  %v517_v38 = vpop.f32.mrf.mxu1  ;;  %v4225_v30 = vld [vmem:[%s4934_s5 + $0x1e0] ss:$8 sps:$4 sm:$0xff]   ;;  %v4231_v32 = vld [vmem:[%s4934_s5 + $0x1d4] ss:$8 sps:$4 sm:$0xff]  }
 0x168   :  { %v527_v40 = vmax.f32 %v366_v37, %v517_v38  ;;  %v553_v9 = vpack.c.bf16 %v549_v36, %v547_v35  ;;  %v544_v45 = vadd.f32 %v533_v19, %v526_v33  ;;  %v4153_v19 = vld [vmem:[%s4934_s5 + $0x110] ss:$8 sps:$4 sm:$0xff]   ;;  %4988 = vst [vmem:[#allocation12_spill] sm:$0xff] %v4225_v30  ;;  %4989 = vst [vmem:[#allocation13_spill] sm:$0xff] %v4231_v32  ;;  %v4244_v35 = vld [vmem:[%s4934_s5 + $0xc4] ss:$8 sps:$4 sm:$0xff]  }
 0x169   :  { %v368_v44 = vpop.f32.mrf.mxu0  ;;  %v519_v43 = vpop.f32.mrf.mxu1  ;;  %v4237_v33 = vld [vmem:[%s4934_s5 + $0xd0] ss:$8 sps:$4 sm:$0xff]   ;;  %v4255_v37 = vld [vmem:[%s4934_s5 + $0x1c4] ss:$8 sps:$4 sm:$0xff]   ;;  %v4261_v38 = vld [vmem:[%s4934_s5 + $0xc0] ss:$8 sps:$4 sm:$0xff]  }
 0x16a   :  { %v545_v47 = vadd.f32 %v537_v18, %v527_v40  ;;  %2845 = vmatprep.mubr.msk.bf16.mxu0 %vm118_vm4, %v553_v9  ;;  %2862 = vmatprep.mubr.msk.bf16.mxu1 %vm118_vm4, %v553_v9  ;;  %v550_v46 = vmax.f32 %v544_v45, 0.0  ;;  %v4141_v18 = vld [vmem:[%s4934_s5 + $0x10] ss:$8 sps:$4 sm:$0xff]   ;;  %4991 = vst [vmem:[#allocation15_spill] sm:$0xff] %v4255_v37  ;;  %v4268_v39 = vld [vmem:[%s4934_s5 + $0xb4] ss:$8 sps:$4 sm:$0xff]  }
 0x16b   :  { %v369_v31 = vpop.f32.mrf.mxu0  ;;  %v520_v5 = vpop.f32.mrf.mxu1  ;;  %715 = vmatmul.mubr.bf16.vlgmr.msra.gmra.mxu0 %v552_v42  ;;  %883 = vmatmul.mubr.bf16.vlgmr.msra.gmra.mxu1 %v552_v42  ;;  %v4249_v36 = vld [vmem:[%s4934_s5 + $0x1d0] ss:$8 sps:$4 sm:$0xff]   ;;  %v4273_v40 = vld [vmem:[%s4934_s5 + $0x1c0] ss:$8 sps:$4 sm:$0xff]   ;;  %v4279_v9 = vld [vmem:[%s4934_s5 + $0x1b4] ss:$8 sps:$4 sm:$0xff]  }
 0x16c   :  { %v551_v41 = vmax.f32 %v545_v47, 0.0  ;;  %v554_v49 = vpack.c.bf16 %v550_v46, %v550_v46  ;;  %1451 = vmatpush1.bf16.msra.mxu0 %v3988_v50  ;;  %1492 = vmatpush1.bf16.msra.mxu1 %v4003_v53  ;;  %4990 = vst [vmem:[#allocation14_spill] sm:$0xff] %v4249_v36  ;;  %4992 = vst [vmem:[#allocation16_spill] sm:$0xff] %v4273_v40  ;;  %v4285_v44 = vld [vmem:[%s4934_s5 + $0xb0] ss:$8 sps:$4 sm:$0xff]  }
 0x16d   :  { %1452 = vmatprep.subr.bf16.mxu0 %v3998_v52  ;;  %1493 = vmatprep.subr.bf16.mxu1 %v4021_v57  ;;  %4993 = vst [vmem:[#allocation17_spill] sm:$0xff] %v4279_v9  ;;  %v4292_v43 = vld [vmem:[%s4934_s5 + $0xa4] ss:$8 sps:$4 sm:$0xff]   ;;  %v4297_v42 = vld [vmem:[%s4934_s5 + $0x1b0] ss:$8 sps:$4 sm:$0xff]  }
 0x16e   :  { %v555_v48 = vpack.c.bf16 %v551_v41, %v551_v41  ;;  %4994 = vst [vmem:[#allocation18_spill] sm:$0xff] %v4297_v42  ;;  %v4304_v45 = vld [vmem:[%s4934_s5 + $0xa0] ss:$8 sps:$4 sm:$0xff]  }
 0x16f   :  { %4995 = vst [vmem:[#allocation19_spill] sm:$0xff] %v4304_v45 }
 0x170   :  { %2846 = vmatprep.mubr.msk.bf16.mxu0 %vm118_vm4, %v555_v48  ;;  %2863 = vmatprep.mubr.msk.bf16.mxu1 %vm118_vm4, %v555_v48 }
 0x171   :  { %1453 = vmatpush1.bf16.msra.mxu0 %v4015_v56  ;;  %1494 = vmatpush1.bf16.msra.mxu1 %v4033_v59 }
 0x172   :  { %1454 = vmatprep.subr.bf16.mxu0 %v4028_v58  ;;  %1495 = vmatprep.subr.bf16.mxu1 %v4039_v60 }
 0x173   :  { %723 = vmatmul.mubr.bf16.gmra.mxu0 %v554_v49  ;;  %891 = vmatmul.mubr.bf16.gmra.mxu1 %v554_v49 }
 0x175   :  { %1455 = vmatpush1.bf16.msra.mxu0 %v4045_v61  ;;  %1496 = vmatpush1.bf16.msra.mxu1 %v4057_v63 }
 0x176   :  { %1456 = vmatprep.subr.bf16.mxu0 %v4052_v62  ;;  %1497 = vmatprep.subr.bf16.mxu1 %v4063_v0 }
 0x179   :  { %1457 = vmatpush1.bf16.msra.mxu0 %v4069_v1  ;;  %1498 = vmatpush1.bf16.msra.mxu1 %v4081_v4 }
 0x17a   :  { %1458 = vmatprep.subr.bf16.mxu0 %v4076_v3  ;;  %1499 = vmatprep.subr.bf16.mxu1 %v4087_v6 }
 0x17d   :  { %1459 = vmatpush1.bf16.msra.mxu0 %v4093_v7  ;;  %1500 = vmatpush1.bf16.msra.mxu1 %v4105_v11 }
 0x17e   :  { %1460 = vmatprep.subr.bf16.mxu0 %v4100_v8  ;;  %1501 = vmatprep.subr.bf16.mxu1 %v4111_v12 }
 0x181   :  { %1461 = vmatpush1.bf16.msra.mxu0 %v4117_v14  ;;  %1502 = vmatpush1.bf16.msra.mxu1 %v4129_v16 }
 0x182   :  { %1462 = vmatprep.subr.bf16.mxu0 %v4124_v15  ;;  %1503 = vmatprep.subr.bf16.mxu1 %v4135_v17 }
 0x185   :  { %1463 = vmatpush1.bf16.msra.mxu0 %v4141_v18  ;;  %1504 = vmatpush1.bf16.msra.mxu1 %v4153_v19 }
 0x186   :  { %1464 = vmatprep.subr.bf16.mxu0 %v4148_v2  ;;  %1505 = vmatprep.subr.bf16.mxu1 %v4159_v20 }
 0x189   :  { %1465 = vmatpush1.bf16.msra.mxu0 %v4165_v34  ;;  %1506 = vmatpush1.bf16.msra.mxu1 %v4177_v22 }
 0x18a   :  { %1466 = vmatprep.subr.bf16.mxu0 %v4172_v21  ;;  %1507 = vmatprep.subr.bf16.mxu1 %v4183_v23 }
 0x18d   :  { %1467 = vmatpush2.bf16.msra.mxu0 %v4189_v24  ;;  %1508 = vmatpush2.bf16.msra.mxu1 %v4201_v26 }
 0x18e   :  { %1468 = vmatprep.subr.bf16.mxu0 %v4196_v25  ;;  %1509 = vmatprep.subr.bf16.mxu1 %v4207_v27 }
 0x191   :  { %1469 = vmatpush2.bf16.msra.mxu0 %v4213_v28  ;;  %1510 = vmatpush2.bf16.msra.mxu1 %v4225_v30 }
 0x192   :  { %1470 = vmatprep.subr.bf16.mxu0 %v4220_v29  ;;  %1511 = vmatprep.subr.bf16.mxu1 %v4231_v32 }
 0x195   :  { %1471 = vmatpush2.bf16.msra.mxu0 %v4237_v33  ;;  %1512 = vmatpush2.bf16.msra.mxu1 %v4249_v36 }
 0x196   :  { %1472 = vmatprep.subr.bf16.mxu0 %v4244_v35  ;;  %1513 = vmatprep.subr.bf16.mxu1 %v4255_v37 }
 0x199   :  { %1473 = vmatpush2.bf16.msra.mxu0 %v4261_v38  ;;  %1514 = vmatpush2.bf16.msra.mxu1 %v4273_v40 }
 0x19a   :  { %1474 = vmatprep.subr.bf16.mxu0 %v4268_v39  ;;  %1515 = vmatprep.subr.bf16.mxu1 %v4279_v9 }
 0x19d   :  { %1475 = vmatpush2.bf16.msra.mxu0 %v4285_v44  ;;  %1516 = vmatpush2.bf16.msra.mxu1 %v4297_v42  ;;  %v4314_v42 = vld [vmem:[%s4934_s5 + $0x94] ss:$8 sps:$4 sm:$0xff]  }
 0x19e   :  { %1476 = vmatprep.subr.bf16.mxu0 %v4292_v43  ;;  %4996 = vst [vmem:[#allocation20_spill] sm:$0xff] %v4314_v42 }
 0x1a1   :  { %1477 = vmatpush2.bf16.msra.mxu0 %v4304_v45 }
 0x1a2   :  { %1478 = vmatprep.subr.bf16.mxu0 %v4314_v42 }
 0x22b   :  { %v716_v47 = vpop.f32.mrf.mxu0  ;;  %v884_v31 = vpop.f32.mrf.mxu1 }
 0x22c   :  { %v898_v5 = vmax.f32 %v716_v47, %v884_v31  ;;  %v4319_v47 = vld [vmem:[%s4934_s5 + $0x1a4] ss:$8 sps:$4 sm:$0xff]  }
 0x22d   :  { %v718_v41 = vpop.f32.mrf.mxu0  ;;  %v886_v46 = vpop.f32.mrf.mxu1  ;;  %4997 = vst [vmem:[#allocation21_spill] sm:$0xff] %v4319_v47  ;;  %1517 = vmatprep.subr.bf16.mxu1 %v4319_v47 }
 0x22e   :  { %902 = vst.msk [vmem:[#allocation2] sm:$0xff] %vm901_vm7, %v898_v5  ;;  %v4339_v41 = vld [vmem:[%s4934_s5 + $0x84] ss:$8 sps:$4 sm:$0xff]   ;;  %v4344_v46 = vld [vmem:[%s4934_s5 + $0x194] ss:$8 sps:$4 sm:$0xff]  }
 0x22f   :  { %v719_v48 = vpop.f32.mrf.mxu0  ;;  %v887_v49 = vpop.f32.mrf.mxu1  ;;  %5000 = vst [vmem:[#allocation24_spill] sm:$0xff] %v4339_v41  ;;  %5001 = vst [vmem:[#allocation25_spill] sm:$0xff] %v4344_v46 }
 0x230   :  { %v899_v55 = vmax.f32 %v719_v48, %v887_v49  ;;  %v4349_v48 = vld [vmem:[%s4934_s5 + $0x80] ss:$8 sps:$4 sm:$0xff]   ;;  %v4354_v49 = vld [vmem:[%s4934_s5 + $0x190] ss:$8 sps:$4 sm:$0xff]  }
 0x231   :  { %v721_v10 = vpop.f32.mrf.mxu0  ;;  %v889_v13 = vpop.f32.mrf.mxu1  ;;  %5002 = vst [vmem:[#allocation26_spill] sm:$0xff] %v4349_v48  ;;  %5003 = vst [vmem:[#allocation27_spill] sm:$0xff] %v4354_v49 }
 0x232   :  { %903 = vst.msk [vmem:[#allocation2 + $0x8] sm:$0xff] %vm901_vm7, %v899_v55  ;;  %v4324_v10 = vld [vmem:[%s4934_s5 + $0x90] ss:$8 sps:$4 sm:$0xff]   ;;  %v4329_v55 = vld [vmem:[%s4934_s5 + $0x1a0] ss:$8 sps:$4 sm:$0xff]  }
 0x233   :  { %v724_v9 = vpop.f32.mrf.mxu0  ;;  %v892_v40 = vpop.f32.mrf.mxu1  ;;  %4998 = vst [vmem:[#allocation22_spill] sm:$0xff] %v4324_v10  ;;  %4999 = vst [vmem:[#allocation23_spill] sm:$0xff] %v4329_v55  ;;  %1479 = vmatpush2.bf16.msra.mxu0 %v4324_v10  ;;  %1518 = vmatpush2.bf16.msra.mxu1 %v4329_v55 }
 0x234   :  { %v900_v31 = vmax.f32 %v724_v9, %v892_v40  ;;  %1480 = vmatprep.subr.bf16.mxu0 %v4339_v41  ;;  %1519 = vmatprep.subr.bf16.mxu1 %v4344_v46 }
 0x235   :  { %v726_v13 = vpop.f32.mrf.mxu0  ;;  %v894_v5 = vpop.f32.mrf.mxu1 }
 0x236   :  { %904 = vst.msk [vmem:[#allocation2 + $0x10] sm:$0xff] %vm901_vm7, %v900_v31  ;;  %v4360_v5 = vld [vmem:[#allocation2 + $0x1] ss:$2 sm:$0xf] }
 0x237   :  { %v727_v40 = vpop.f32.mrf.mxu0  ;;  %v895_v9 = vpop.f32.mrf.mxu1  ;;  %1481 = vmatpush2.bf16.msra.mxu0 %v4349_v48  ;;  %1520 = vmatpush2.bf16.msra.mxu1 %v4354_v49  ;;  %5004 = vst [vmem:[#allocation28_spill] sm:$0xff] %v4360_v5 }
 0x238   :  { %v4365_v40 = vld [vmem:[%s4934_s5 + $0x184] ss:$8 sps:$4 sm:$0xff]   ;;  %v4370_v9 = vld [vmem:[%s4934_s5 + $0x250] sm:$0xff] }
 0x239   :  { %v728_v31 = vpop.f32.mrf.mxu0  ;;  %v896_v13 = vpop.f32.mrf.mxu1  ;;  %5005 = vst [vmem:[#allocation29_spill] sm:$0xff] %v4365_v40  ;;  %v4379_v49 = vcombine.high %v4370_v9, %v4370_v9  ;;  %1521 = vmatprep.subr.bf16.mxu1 %v4365_v40  ;;  %v911_v48 = vld [vmem:[#allocation2 + $0x3] ss:$2 sm:$0xf] }
 0x23a   :  { %v909_v31 = vld [vmem:[#allocation2 + $0x2] ss:$2 sm:$0xf] }
 0x23b   :  { %v4375_v13 = vld [vmem:[%s4934_s5 + $0x180] ss:$8 sps:$4 sm:$0xff]   ;;  %5007 = vst [vmem:[#allocation31_spill] sm:$0xff] %v4379_v49  ;;  %2940 = vmatprep.subr.msk.bf16.mxu0 %vm183_vm5, %v4379_v49 }
 0x23c   :  { %5006 = vst [vmem:[#allocation30_spill] sm:$0xff] %v4375_v13  ;;  %1522 = vmatpush2.bf16.msra.mxu1 %v4375_v13  ;;  %v1574_v13 = vld [vmem:[#allocation2 + $0x5] ss:$2 sm:$0xf] }
 0x23d   :  { %v941_v46 = vld [vmem:[#allocation2 + $0xe] ss:$2 sm:$0xf]  ;;  %v4381_v55 = vld [vmem:[#allocation2 + $0xd] ss:$2 sm:$0xf]  ;;  %1638 = vmatprep.subr.bf16.mxu1 %v3993_v51 }
 0x23e   :  { %5008 = vst [vmem:[#allocation32_spill] sm:$0xff] %v4381_v55  ;;  %v3205_v47 = vpack.i.bf16 %v909_v31, %v941_v46  ;;  %v3200_v37 = vpack.i.bf16 %v4360_v5, %v4381_v55  ;;  %v943_v36 = vld [vmem:[#allocation2 + $0xf] ss:$2 sm:$0xf] }
 0x23f   :  { %v3210_v32 = vpack.i.bf16 %v911_v48, %v943_v36  ;;  %v945_v41 = vld [vmem:[#allocation2 + $0x10] ss:$2 sm:$0xf]  ;;  %v913_v46 = vld [vmem:[#allocation2 + $0x4] ss:$2 sm:$0xf] }
 0x240   :  { %3206 = vrot.lane.b32.xlu1 %v3205_v47, %s3528_s28  ;;  %3201 = vrot.lane.b32.xlu0 %v3200_v37, %s3530_s26  ;;  %v3220_v31 = vpack.i.bf16 %v913_v46, %v945_v41  ;;  %v1593_v51 = vld [vmem:[#allocation2 + $0x11] ss:$2 sm:$0xf] }
 0x244   :  { %959 = vrot.lane.b32.xlu1 %v945_v41, %s3531_s24  ;;  %3211 = vrot.lane.b32.xlu0 %v3210_v32, %s3532_s25  ;;  %v937_v32 = vld [vmem:[#allocation2 + $0xc] ss:$2 sm:$0xf] }
 0x248   :  { %3216 = vrot.lane.b32.xlu1 %v3205_v47, %s3530_s26  ;;  %927 = vrot.lane.b32.xlu0 %v913_v46, %s3531_s24 }
 0x24c   :  { %1578 = vrot.lane.b32.xlu1 %v911_v48, %s3528_s28  ;;  %1597 = vrot.lane.b32.xlu0 %v943_v36, %s3528_s28  ;;  %v905_v48 = vld [vmem:[#allocation2] ss:$2 sm:$0xf] }
 0x250   :  { %1604 = vrot.lane.b32.xlu1 %v1593_v51, %s3531_s24  ;;  %3221 = vrot.lane.b32.xlu0 %v3220_v31, %s3532_s25 }
 0x254   :  { %1585 = vrot.lane.b32.xlu0 %v1574_v13, %s3531_s24  ;;  %v2938_v13 = vcombine.low %v4370_v9, %v4370_v9 }
 0x2b2   :  { %v3207_v37 = vpop.permute.xlu1 %3206  ;;  %v3202_v40 = vpop.permute.xlu0 %3201 }
 0x2b3   :  { %v3209_v49 = vunpack.i.h.bf16 %v3207_v37  ;;  %v3208_v30 = vunpack.i.l.bf16 %v3207_v37  ;;  %v3204_v5 = vunpack.i.h.bf16 %v3202_v40  ;;  %v3203_v10 = vunpack.i.l.bf16 %v3202_v40 }
 0x2b5   :  { %v962_v47 = vsel %vm901_vm7, %v937_v32, %v3203_v10  ;;  %v963_v27 = vsel %vm118_vm4, %v3203_v10, %v3208_v30  ;;  %v930_v51 = vsel %vm901_vm7, %v905_v48, %v3204_v5  ;;  %v931_v40 = vsel %vm118_vm4, %v3204_v5, %v3209_v49 }
 0x2b6   :  { %v970_v36 = vrot.slane %v962_v47, 4  ;;  %v971_v41 = vrot.slane %v963_v27, 4  ;;  %v4395_v46 = vpop.permute.xlu1 %959  ;;  %v3212_v31 = vpop.permute.xlu0 %3211 }
 0x2b7   :  { %v3214_v37 = vunpack.i.h.bf16 %v3212_v31  ;;  %v3213_v42 = vunpack.i.l.bf16 %v3212_v31 }
 0x2b8   :  { %v980_v32 = vsel %vm183_vm5, %v930_v51, %v970_v36  ;;  %v981_v10 = vsel %vm183_vm5, %v931_v40, %v971_v41  ;;  %v4414_v41 = vsel %vm183_vm5, %v2938_v13, 0 }
 0x2b9   :  { %v1060_v26 = vpack.c.bf16 %v980_v32, %v980_v32  ;;  %v964_v27 = vsel %vm932_vm8, %v3208_v30, %v3213_v42  ;;  %v965_v47 = vsel %vm934_vm9, %v3213_v42, %v4395_v46  ;;  %v1061_v23 = vpack.c.bf16 %v981_v10, %v981_v10  ;;  %v4419_v30 = vld [vmem:[%s4934_s5 + $0x244] ss:$8 sps:$4 sm:$0xff]   ;;  %v4428_v32 = vld [vmem:[%s4934_s5 + $0x240] ss:$8 sps:$4 sm:$0xff]  }
 0x2ba   :  { %v972_v45 = vrot.slane %v964_v27, 4  ;;  %v4406_v55 = vpop.permute.xlu1 %3216  ;;  %v4408_v9 = vpop.permute.xlu0 %927  ;;  %v973_v48 = vrot.slane %v965_v47, 4  ;;  %v933_v5 = vsel %vm932_vm8, %v3209_v49, %v3214_v37  ;;  %v5009_v10 = vmov 0  }
 0x2bb   :  { %v935_v36 = vsel %vm934_vm9, %v3214_v37, %v4408_v9  ;;  %1482 = vmatprep.mubr.bf16.mxu0 %v1061_v23  ;;  %v3218_v40 = vunpack.i.l.bf16 %v4406_v55 }
 0x2bc   :  { %v982_v42 = vsel %vm183_vm5, %v933_v5, %v972_v45  ;;  %v983_v31 = vsel %vm183_vm5, %v935_v36, %v973_v48  ;;  %1483 = vmatmul.mubr.bf16.vlgmr.msra.gmra.mxu0 %v1060_v26  ;;  %v3219_v45 = vunpack.i.h.bf16 %v4406_v55  ;;  %v4439_v26 = vld [vmem:[%s4934_s5 + $0x234] ss:$8 sps:$4 sm:$0xff]   ;;  %v4449_v5 = vld [vmem:[%s4934_s5 + $0x230] ss:$8 sps:$4 sm:$0xff]  }
 0x2bd   :  { %v1062_v51 = vpack.c.bf16 %v982_v42, %v982_v42  ;;  %v1063_v49 = vpack.c.bf16 %v983_v31, %v983_v31  ;;  %1537 = vmatpush1.bf16.msra.mxu0 %v4414_v41  ;;  %1564 = vmatprep.mubr.bf16.mxu0 %v5009_v10  ;;  %v3397_v55 = vld [vmem:[%s4936_s7 + $0x30] sm:$0xff]  }
 0x2be   :  { %v1579_v37 = vpop.permute.xlu1 %1578  ;;  %v1598_v13 = vpop.permute.xlu0 %1597  ;;  %1538 = vmatprep.subr.bf16.mxu0 %v4419_v30 }
 0x2bf   :  { %v1608_v23 = vsel %vm118_vm4, %v3218_v40, %v1598_v13  ;;  %1523 = vmatprep.mubr.bf16.mxu1 %v1063_v49  ;;  %v1589_v47 = vsel %vm118_vm4, %v3219_v45, %v1579_v37 }
 0x2c0   :  { %v1616_v27 = vrot.slane %v1608_v23, 4  ;;  %1524 = vmatmul.mubr.bf16.vlgmr.msra.gmra.mxu1 %v1062_v51 }
 0x2c1   :  { %1639 = vmatpush1.bf16.msra.mxu1 %v3988_v50  ;;  %1539 = vmatpush1.bf16.msra.mxu0 %v4428_v32  ;;  %v4457_v50 = vld [vmem:[%s4934_s5 + $0x224] ss:$8 sps:$4 sm:$0xff]  }
 0x2c2   :  { %v3222_v48 = vpop.permute.xlu0 %3221  ;;  %1640 = vmatprep.subr.bf16.mxu1 %v3998_v52  ;;  %v1626_v36 = vsel %vm183_vm5, %v1589_v47, %v1616_v27  ;;  %1540 = vmatprep.subr.bf16.mxu0 %v4439_v26  ;;  %v4466_v27 = vld [vmem:[%s4934_s5 + $0x220] ss:$8 sps:$4 sm:$0xff]  }
 0x2c3   :  { %v3224_v42 = vunpack.i.h.bf16 %v3222_v48  ;;  %v3223_v31 = vunpack.i.l.bf16 %v3222_v48  ;;  %v1631_v51 = vpack.c.bf16 %v1626_v36, %v1626_v36 }
 0x2c5   :  { %v1590_v49 = vsel %vm932_vm8, %v1579_v37, %v3224_v42  ;;  %v1609_v23 = vsel %vm932_vm8, %v1598_v13, %v3223_v31  ;;  %1641 = vmatpush1.bf16.msra.mxu1 %v4015_v56  ;;  %1670 = vmatprep.mubr.bf16.mxu1 %v1631_v51  ;;  %v4473_v37 = vld [vmem:[%s4934_s5 + $0x214] ss:$8 sps:$4 sm:$0xff]   ;;  %v4478_v13 = vpop.permute.xlu1 %1604 }
 0x2c6   :  { %v1617_v52 = vrot.slane %v1609_v23, 4  ;;  %1541 = vmatpush1.bf16.msra.mxu0 %v4449_v5  ;;  %1642 = vmatprep.subr.bf16.mxu1 %v4028_v58  ;;  %v1610_v47 = vsel %vm934_vm9, %v3223_v31, %v4478_v13  ;;  %v4487_v58 = vld [vmem:[%s4934_s5 + $0x210] ss:$8 sps:$4 sm:$0xff]   ;;  %v4490_v48 = vpop.permute.xlu0 %1585  ;;  %v974_v31 = vrot.slane %v4395_v46, 4  ;;  %v3407_v23 = vld [vmem:[%s4936_s7 + $0x8] sm:$0xff]  }
 0x2c7   :  { %1542 = vmatprep.subr.bf16.mxu0 %v4457_v50  ;;  %v1618_v36 = vrot.slane %v1610_v47, 4  ;;  %v1591_v51 = vsel %vm934_vm9, %v3224_v42, %v4490_v48  ;;  %v3413_v47 = vld [vmem:[%s4936_s7 + $0x40] sm:$0xff]  }
 0x2c8   :  { %v4476_v56 = vsel %vm183_vm5, %v1590_v49, %v1617_v52  ;;  %v984_v49 = vsel %vm183_vm5, %v4408_v9, %v974_v31  ;;  %v3398_v9 = vld [vmem:[%s4937_s8 + $0x30] sm:$0xff]   ;;  %v3408_v52 = vld [vmem:[%s4937_s8 + $0x8] sm:$0xff]  }
 0x2c9   :  { %1643 = vmatpush1.bf16.msra.mxu1 %v4045_v61  ;;  %v4496_v61 = vld [vmem:[%s4934_s5 + $0x204] ss:$8 sps:$4 sm:$0xff]   ;;  %v1064_v46 = vpack.c.bf16 %v984_v49, %v984_v49 }
 0x2ca   :  { %1543 = vmatpush1.bf16.msra.mxu0 %v4466_v27  ;;  %1644 = vmatprep.subr.bf16.mxu1 %v4052_v62  ;;  %v4506_v62 = vld [vmem:[%s4934_s5 + $0x200] ss:$8 sps:$4 sm:$0xff]  }
 0x2cb   :  { %1544 = vmatprep.subr.bf16.mxu0 %v4473_v37 }
 0x2cd   :  { %1645 = vmatpush1.bf16.msra.mxu1 %v4069_v1  ;;  %v1628_v1 = vsel %vm183_vm5, %v1591_v51, %v1618_v36 }
 0x2ce   :  { %1545 = vmatpush1.bf16.msra.mxu0 %v4487_v58  ;;  %1646 = vmatprep.subr.bf16.mxu1 %v4076_v3  ;;  %v1633_v42 = vpack.c.bf16 %v1628_v1, %v1628_v1  ;;  %v5015_v3 = vld [vmem:[#allocation11_spill] sm:$0xff] }
 0x2cf   :  { %1546 = vmatprep.subr.bf16.mxu0 %v4496_v61 }
 0x2d1   :  { %1647 = vmatpush1.bf16.msra.mxu1 %v4093_v7 }
 0x2d2   :  { %1547 = vmatpush1.bf16.msra.mxu0 %v4506_v62  ;;  %1648 = vmatprep.subr.bf16.mxu1 %v4100_v8  ;;  %v5018_v8 = vld [vmem:[#allocation12_spill] sm:$0xff] }
 0x2d3   :  { %1679 = vmatprep.subr.bf16.mxu0 %v4008_v54  ;;  %v5011_v54 = vld [vmem:[#allocation32_spill] sm:$0xff] }
 0x2d5   :  { %2941 = vmatmul.mubr.msk.bf16.vlgmr.msra.gmra.mxu0 %vm1440_vm10, %v1064_v46  ;;  %1649 = vmatpush1.bf16.msra.mxu1 %v4117_v14 }
 0x2d6   :  { %1680 = vmatpush1.bf16.msra.mxu0 %v4003_v53  ;;  %1711 = vmatprep.mubr.bf16.mxu0 %v1633_v42  ;;  %v5010_v53 = vld [vmem:[#allocation9_spill] sm:$0xff] }
 0x2d7   :  { %1650 = vmatprep.subr.bf16.mxu1 %v4124_v15  ;;  %1681 = vmatprep.subr.bf16.mxu0 %v4021_v57  ;;  %v1607_v57 = vsel %vm901_vm7, %v5011_v54, %v3218_v40  ;;  %v5021_v15 = vld [vmem:[#allocation26_spill] sm:$0xff] }
 0x2d8   :  { %v3401_v40 = vld [vmem:[%s4936_s7 + $0x20] sm:$0xff]  }
 0x2d9   :  { %1651 = vmatpush1.bf16.msra.mxu1 %v4141_v18  ;;  %v5023_v18 = vld [vmem:[#allocation31_spill] sm:$0xff] }
 0x2da   :  { %1682 = vmatpush1.bf16.msra.mxu0 %v4033_v59  ;;  %1652 = vmatprep.subr.bf16.mxu1 %v4148_v2  ;;  %v5012_v59 = vld [vmem:[#allocation19_spill] sm:$0xff] }
 0x2db   :  { %1683 = vmatprep.subr.bf16.mxu0 %v4039_v60  ;;  %v5013_v60 = vld [vmem:[#allocation10_spill] sm:$0xff]  ;;  %v5024_v2 = vld [vmem:[#allocation15_spill] sm:$0xff] }
 0x2dd   :  { %1653 = vmatpush1.bf16.msra.mxu1 %v4165_v34  ;;  %v5027_v34 = vld [vmem:[#allocation18_spill] sm:$0xff] }
 0x2de   :  { %1684 = vmatpush1.bf16.msra.mxu0 %v4057_v63  ;;  %1654 = vmatprep.subr.bf16.mxu1 %v4172_v21  ;;  %v5014_v63 = vld [vmem:[#allocation20_spill] sm:$0xff]  ;;  %v5028_v21 = vld [vmem:[#allocation21_spill] sm:$0xff] }
 0x2df   :  { %1685 = vmatprep.subr.bf16.mxu0 %v4063_v0  ;;  %v1615_v0 = vrot.slane %v1607_v57, 4 }
 0x2e1   :  { %1655 = vmatpush2.bf16.msra.mxu1 %v4189_v24  ;;  %v5030_v24 = vld [vmem:[#allocation25_spill] sm:$0xff] }
 0x2e2   :  { %1686 = vmatpush1.bf16.msra.mxu0 %v4081_v4  ;;  %1656 = vmatprep.subr.bf16.mxu1 %v4196_v25  ;;  %v5016_v4 = vld [vmem:[#allocation22_spill] sm:$0xff]  ;;  %v5031_v25 = vld [vmem:[#allocation27_spill] sm:$0xff] }
 0x2e3   :  { %1687 = vmatprep.subr.bf16.mxu0 %v4087_v6  ;;  %v5017_v6 = vld [vmem:[#allocation28_spill] sm:$0xff] }
 0x2e4   :  { %v1588_v7 = vsel %vm901_vm7, %v5017_v6, %v3219_v45  ;;  %v3403_v45 = vld [vmem:[%s4936_s7 + $0x18] sm:$0xff]  }
 0x2e5   :  { %1657 = vmatpush2.bf16.msra.mxu1 %v4213_v28  ;;  %v1625_v14 = vsel %vm183_vm5, %v1588_v7, %v1615_v0  ;;  %v5032_v28 = vld [vmem:[#allocation29_spill] sm:$0xff] }
 0x2e6   :  { %1688 = vmatpush1.bf16.msra.mxu0 %v4105_v11  ;;  %1658 = vmatprep.subr.bf16.mxu1 %v4220_v29  ;;  %v5019_v11 = vld [vmem:[#allocation24_spill] sm:$0xff]  ;;  %v1619_v29 = vrot.slane %v4478_v13, 4 }
 0x2e7   :  { %1689 = vmatprep.subr.bf16.mxu0 %v4111_v12  ;;  %v5020_v12 = vld [vmem:[#allocation13_spill] sm:$0xff]  ;;  %v3412_v13 = vld [vmem:[%s4937_s8 + $0x48] sm:$0xff]  }
 0x2e9   :  { %1659 = vmatpush2.bf16.msra.mxu1 %v4237_v33  ;;  %v5033_v33 = vld [vmem:[#allocation30_spill] sm:$0xff] }
 0x2ea   :  { %1690 = vmatpush1.bf16.msra.mxu0 %v4129_v16  ;;  %1660 = vmatprep.subr.bf16.mxu1 %v4244_v35  ;;  %v5022_v16 = vld [vmem:[#allocation14_spill] sm:$0xff]  ;;  %v1629_v35 = vsel %vm183_vm5, %v4490_v48, %v1619_v29 }
 0x2eb   :  { %1691 = vmatprep.subr.bf16.mxu0 %v4135_v17  ;;  %v1630_v17 = vpack.c.bf16 %v1625_v14, %v1625_v14 }
 0x2ed   :  { %1661 = vmatpush2.bf16.msra.mxu1 %v4261_v38  ;;  %v1632_v38 = vpack.c.bf16 %v4476_v56, %v4476_v56  ;;  %v3411_v56 = vld [vmem:[%s4936_s7 + $0x48] sm:$0xff]  }
 0x2ee   :  { %1692 = vmatpush1.bf16.msra.mxu0 %v4153_v19  ;;  %1662 = vmatprep.subr.bf16.mxu1 %v4268_v39  ;;  %v5025_v19 = vld [vmem:[#allocation16_spill] sm:$0xff]  ;;  %v1634_v39 = vpack.c.bf16 %v1629_v35, %v1629_v35 }
 0x2ef   :  { %1693 = vmatprep.subr.bf16.mxu0 %v4159_v20  ;;  %v5026_v20 = vld [vmem:[#allocation17_spill] sm:$0xff] }
 0x2f1   :  { %1663 = vmatpush2.bf16.msra.mxu1 %v4285_v44  ;;  %v3395_v44 = vld [vmem:[%s4936_s7 + $0x38] sm:$0xff]  }
 0x2f2   :  { %1694 = vmatpush1.bf16.msra.mxu0 %v4177_v22  ;;  %1664 = vmatprep.subr.bf16.mxu1 %v4292_v43  ;;  %v5029_v22 = vld [vmem:[#allocation23_spill] sm:$0xff]  ;;  %v3396_v43 = vld [vmem:[%s4937_s8 + $0x38] sm:$0xff]  }
 0x2f3   :  { %1695 = vmatprep.subr.bf16.mxu0 %v5010_v53 }
 0x2f5   :  { %1665 = vmatpush2.bf16.msra.mxu1 %v5012_v59 }
 0x2f6   :  { %1696 = vmatpush2.bf16.msra.mxu0 %v5013_v60  ;;  %1666 = vmatprep.subr.bf16.mxu1 %v5014_v63 }
 0x2f7   :  { %1697 = vmatprep.subr.bf16.mxu0 %v5015_v3 }
 0x2f9   :  { %1667 = vmatpush2.bf16.msra.mxu1 %v5016_v4 }
 0x2fa   :  { %1698 = vmatpush2.bf16.msra.mxu0 %v5018_v8  ;;  %1668 = vmatprep.subr.bf16.mxu1 %v5019_v11  ;;  %v1763_v8 = vld [vmem:[%s4935_s6] sm:$0x3] }
 0x2fb   :  { %1699 = vmatprep.subr.bf16.mxu0 %v5020_v12 }
 0x2fd   :  { %1669 = vmatpush2.bf16.msra.mxu1 %v5021_v15 }
 0x2fe   :  { %1700 = vmatpush2.bf16.msra.mxu0 %v5022_v16  ;;  %2942 = vmatprep.subr.msk.bf16.mxu1 %vm183_vm5, %v5023_v18  ;;  %v5034_v18 = vld [vmem:[#allocation8_spill] sm:$0xff] }
 0x2ff   :  { %1701 = vmatprep.subr.bf16.mxu0 %v5024_v2  ;;  %v1768_v2 = vrot.slane %v1763_v8, %v5034_v18 }
 0x300   :  { %1671 = vmatmul.mubr.bf16.vlgmr.msra.gmra.mxu1 %v1630_v17 }
 0x301   :  { %1725 = vmatpush1.bf16.msra.mxu1 %v4414_v41  ;;  %1752 = vmatprep.mubr.bf16.mxu1 %v5009_v10  ;;  %v3399_v41 = vld [vmem:[%s4936_s7 + $0x28] sm:$0xff]  }
 0x302   :  { %1702 = vmatpush2.bf16.msra.mxu0 %v5025_v19  ;;  %1726 = vmatprep.subr.bf16.mxu1 %v4419_v30  ;;  %v3400_v30 = vld [vmem:[%s4937_s8 + $0x28] sm:$0xff]  }
 0x303   :  { %1703 = vmatprep.subr.bf16.mxu0 %v5026_v20 }
 0x305   :  { %1727 = vmatpush1.bf16.msra.mxu1 %v4428_v32  ;;  %v3402_v32 = vld [vmem:[%s4937_s8 + $0x20] sm:$0xff]  }
 0x306   :  { %1704 = vmatpush2.bf16.msra.mxu0 %v5027_v34  ;;  %1728 = vmatprep.subr.bf16.mxu1 %v4439_v26  ;;  %v3404_v26 = vld [vmem:[%s4937_s8 + $0x18] sm:$0xff]  }
 0x307   :  { %1705 = vmatprep.subr.bf16.mxu0 %v5028_v21 }
 0x309   :  { %1729 = vmatpush1.bf16.msra.mxu1 %v4449_v5  ;;  %v3405_v5 = vld [vmem:[%s4936_s7 + $0x10] sm:$0xff]  }
 0x30a   :  { %1706 = vmatpush2.bf16.msra.mxu0 %v5029_v22  ;;  %1730 = vmatprep.subr.bf16.mxu1 %v4457_v50  ;;  %v3406_v50 = vld [vmem:[%s4937_s8 + $0x10] sm:$0xff]   ;;  %v5035_v22 = vld [vmem:[#allocation7_spill] sm:$0xff] }
 0x30b   :  { %1707 = vmatprep.subr.bf16.mxu0 %v5030_v24  ;;  %v1772_v24 = vrot.slane %v1763_v8, %v5035_v22 }
 0x30d   :  { %1731 = vmatpush1.bf16.msra.mxu1 %v4466_v27  ;;  %v3409_v27 = vld [vmem:[%s4936_s7] sm:$0xff]   ;;  %s3533_s7 = smov 32  }
 0x30e   :  { %1708 = vmatpush2.bf16.msra.mxu0 %v5031_v25  ;;  %1732 = vmatprep.subr.bf16.mxu1 %v4473_v37  ;;  %v3410_v37 = vld [vmem:[%s4937_s8] sm:$0xff]  }
 0x30f   :  { %1709 = vmatprep.subr.bf16.mxu0 %v5032_v28 }
 0x311   :  { %1733 = vmatpush1.bf16.msra.mxu1 %v4487_v58  ;;  %v3414_v58 = vld [vmem:[%s4937_s8 + $0x40] sm:$0xff]   ;;  %s3534_s8 = smov 80  }
 0x312   :  { %1710 = vmatpush2.bf16.msra.mxu0 %v5033_v33  ;;  %1734 = vmatprep.subr.bf16.mxu1 %v4496_v61 }
 0x313   :  { %1865 = vmatprep.subr.bf16.mxu0 %v5009_v10 }
 0x315   :  { %1712 = vmatmul.mubr.bf16.vlgmr.msra.gmra.mxu0 %v1632_v38  ;;  %1735 = vmatpush1.bf16.msra.mxu1 %v4506_v62 }
 0x316   :  { %1985 = vmatprep.subr.bf16.mxu1 %v5009_v10  ;;  %1866 = vmatpush1.bf16.msra.mxu0 %v3395_v44 }
 0x317   :  { %1867 = vmatprep.subr.bf16.mxu0 %v5009_v10 }
 0x318   :  { %2943 = vmatmul.mubr.msk.bf16.vlgmr.msra.gmra.mxu1 %vm1440_vm10, %v1634_v39 }
 0x319   :  { %1986 = vmatpush1.bf16.msra.mxu1 %v3396_v43 }
 0x31a   :  { %1987 = vmatprep.subr.bf16.mxu1 %v5009_v10  ;;  %1868 = vmatpush1.bf16.msra.mxu0 %v3397_v55  ;;  %v3415_v55 = vld [vmem:[%s4938_s9 + $0x70] ss:$8 sps:$4 sm:$0xff]  }
 0x31b   :  { %1869 = vmatprep.subr.bf16.mxu0 %v5009_v10 }
 0x31d   :  { %1988 = vmatpush1.bf16.msra.mxu1 %v3398_v9  ;;  %v3417_v9 = vld [vmem:[%s4938_s9 + $0x74] ss:$8 sps:$4 sm:$0xff]  }
 0x31e   :  { %1989 = vmatprep.subr.bf16.mxu1 %v5009_v10  ;;  %1870 = vmatpush1.bf16.msra.mxu0 %v3399_v41  ;;  %v3420_v41 = vld [vmem:[%s4938_s9 + $0x64] ss:$8 sps:$4 sm:$0xff]  }
 0x31f   :  { %1871 = vmatprep.subr.bf16.mxu0 %v5009_v10 }
 0x321   :  { %1990 = vmatpush1.bf16.msra.mxu1 %v3400_v30  ;;  %v3418_v30 = vld [vmem:[%s4938_s9 + $0x60] ss:$8 sps:$4 sm:$0xff]  }
 0x322   :  { %1991 = vmatprep.subr.bf16.mxu1 %v5009_v10  ;;  %1872 = vmatpush1.bf16.msra.mxu0 %v3401_v40  ;;  %v3421_v40 = vld [vmem:[%s4938_s9 + $0x50] ss:$8 sps:$4 sm:$0xff]  }
 0x323   :  { %1873 = vmatprep.subr.bf16.mxu0 %v5009_v10 }
 0x325   :  { %1992 = vmatpush1.bf16.msra.mxu1 %v3402_v32  ;;  %v3426_v32 = vld [vmem:[%s4938_s9 + $0x44] ss:$8 sps:$4 sm:$0xff]  }
 0x326   :  { %1993 = vmatprep.subr.bf16.mxu1 %v5009_v10  ;;  %1874 = vmatpush1.bf16.msra.mxu0 %v3403_v45  ;;  %v3451_v45 = vld [vmem:[%s4938_s9 + $0x130] ss:$8 sps:$4 sm:$0xff]  }
 0x327   :  { %1875 = vmatprep.subr.bf16.mxu0 %v5009_v10 }
 0x329   :  { %1994 = vmatpush1.bf16.msra.mxu1 %v3404_v26  ;;  %v3453_v26 = vld [vmem:[%s4938_s9 + $0x134] ss:$8 sps:$4 sm:$0xff]  }
 0x32a   :  { %1995 = vmatprep.subr.bf16.mxu1 %v5009_v10  ;;  %1876 = vmatpush1.bf16.msra.mxu0 %v3405_v5  ;;  %v3459_v5 = vld [vmem:[%s4938_s9 + $0x124] ss:$8 sps:$4 sm:$0xff]  }
 0x32b   :  { %1877 = vmatprep.subr.bf16.mxu0 %v5009_v10 }
 0x32d   :  { %1996 = vmatpush1.bf16.msra.mxu1 %v3406_v50  ;;  %v3424_v50 = vld [vmem:[%s4938_s9 + $0x40] ss:$8 sps:$4 sm:$0xff]  }
 0x32e   :  { %1997 = vmatprep.subr.bf16.mxu1 %v5009_v10  ;;  %1878 = vmatpush1.bf16.msra.mxu0 %v3407_v23  ;;  %v3457_v23 = vld [vmem:[%s4938_s9 + $0x120] ss:$8 sps:$4 sm:$0xff]  }
 0x32f   :  { %1879 = vmatprep.subr.bf16.mxu0 %v5009_v10 }
 0x331   :  { %1998 = vmatpush1.bf16.msra.mxu1 %v3408_v52  ;;  %v3429_v52 = vld [vmem:[%s4938_s9 + $0x34] ss:$8 sps:$4 sm:$0xff]  }
 0x332   :  { %1999 = vmatprep.subr.bf16.mxu1 %v5009_v10  ;;  %1880 = vmatpush1.bf16.msra.mxu0 %v3409_v27  ;;  %v3465_v27 = vld [vmem:[%s4938_s9 + $0x114] ss:$8 sps:$4 sm:$0xff]  }
 0x333   :  { %1893 = vmatprep.subr.bf16.mxu0 %v5009_v10 }
 0x335   :  { %2000 = vmatpush1.bf16.msra.mxu1 %v3410_v37  ;;  %v3427_v37 = vld [vmem:[%s4938_s9 + $0x30] ss:$8 sps:$4 sm:$0xff]  }
 0x336   :  { %2013 = vmatprep.subr.bf16.mxu1 %v5009_v10  ;;  %1894 = vmatpush2.bf16.msra.mxu0 %v3411_v56  ;;  %v3463_v56 = vld [vmem:[%s4938_s9 + $0x110] ss:$8 sps:$4 sm:$0xff]  }
 0x337   :  { %1895 = vmatprep.subr.bf16.mxu0 %v5009_v10 }
 0x339   :  { %2014 = vmatpush2.bf16.msra.mxu1 %v3412_v13  ;;  %v3432_v13 = vld [vmem:[%s4938_s9 + $0x24] ss:$8 sps:$4 sm:$0xff]  }
 0x33a   :  { %2015 = vmatprep.subr.bf16.mxu1 %v5009_v10  ;;  %1896 = vmatpush2.bf16.msra.mxu0 %v3413_v47  ;;  %v3430_v47 = vld [vmem:[%s4938_s9 + $0x20] ss:$8 sps:$4 sm:$0xff]  }
 0x33b   :  { %2309 = vmatprep.subr.bf16.mxu0 %v3417_v9 }
 0x33d   :  { %2016 = vmatpush2.bf16.msra.mxu1 %v3414_v58  ;;  %v3435_v58 = vld [vmem:[%s4938_s9 + $0x14] ss:$8 sps:$4 sm:$0xff]  }
 0x33e   :  { %2358 = vmatprep.subr.bf16.mxu1 %v3453_v26  ;;  %v3483_v26 = vld [vmem:[%s4940_s11 + $0x58] sm:$0xff]  }
 0x37c   :  { %v1484_v48 = vpop.f32.mrf.mxu0 }
 0x37e   :  { %v1486_v61 = vpop.f32.mrf.mxu0 }
 0x380   :  { %v1525_v36 = vpop.f32.mrf.mxu1  ;;  %v1488_v31 = vpop.f32.mrf.mxu0 }
 0x381   :  { %v1526_v51 = vadd.f32 %v1525_v36, %v1484_v48  ;;  %v3433_v48 = vld [vmem:[%s4938_s9 + $0x10] ss:$8 sps:$4 sm:$0xff]   ;;  %v3436_v36 = vld [vmem:[%s4938_s9] ss:$8 sps:$4 sm:$0xff]   ;;  %v3441_v31 = vld [vmem:[%s4938_s9 + $0xf4] ss:$8 sps:$4 sm:$0xff]  }
 0x382   :  { %v1527_v62 = vpop.f32.mrf.mxu1  ;;  %v1489_v49 = vpop.f32.mrf.mxu0 }
 0x383   :  { %v1528_v1 = vadd.f32 %v1527_v62, %v1486_v61  ;;  %v3438_v61 = vld [vmem:[%s4938_s9 + $0x4] ss:$8 sps:$4 sm:$0xff]   ;;  %v3442_v49 = vld [vmem:[%s4938_s9 + $0xe0] ss:$8 sps:$4 sm:$0xff]  }
 0x384   :  { %v1529_v46 = vpop.f32.mrf.mxu1  ;;  %v3444_v62 = vld [vmem:[%s4938_s9 + $0xe4] ss:$8 sps:$4 sm:$0xff]  }
 0x385   :  { %v3445_v46 = vld [vmem:[%s4938_s9 + $0xd0] ss:$8 sps:$4 sm:$0xff]  }
 0x386   :  { %v1530_v42 = vpop.f32.mrf.mxu1 }
 0x387   :  { %v3450_v42 = vld [vmem:[%s4938_s9 + $0xc4] ss:$8 sps:$4 sm:$0xff]  }
 0x395   :  { %v1566_v53 = vpop.f32.mrf.mxu0 }
 0x396   :  { %v1567_v54 = vadd.f32 %v1566_v53, %v1526_v51  ;;  %v3439_v51 = vld [vmem:[%s4938_s9 + $0xf0] ss:$8 sps:$4 sm:$0xff]   ;;  %v3448_v53 = vld [vmem:[%s4938_s9 + $0xc0] ss:$8 sps:$4 sm:$0xff]  }
 0x397   :  { %v1568_v57 = vpop.f32.mrf.mxu0 }
 0x398   :  { %v1569_v59 = vadd.f32 %v1568_v57, %v1528_v1  ;;  %v3447_v1 = vld [vmem:[%s4938_s9 + $0xd4] ss:$8 sps:$4 sm:$0xff]   ;;  %v3454_v57 = vld [vmem:[%s4938_s9 + $0xb0] ss:$8 sps:$4 sm:$0xff]  }
 0x399   :  { %v1570_v60 = vpop.f32.mrf.mxu0 }
 0x39a   :  { %v3460_v60 = vld [vmem:[%s4938_s9 + $0xa0] ss:$8 sps:$4 sm:$0xff]  }
 0x39b   :  { %v1571_v63 = vpop.f32.mrf.mxu0 }
 0x39c   :  { %v3468_v63 = vld [vmem:[%s4938_s9 + $0x94] ss:$8 sps:$4 sm:$0xff]  }
 0x3c0   :  { %v1672_v0 = vpop.f32.mrf.mxu1 }
 0x3c2   :  { %v1674_v3 = vpop.f32.mrf.mxu1 }
 0x3c4   :  { %v1676_v4 = vpop.f32.mrf.mxu1 }
 0x3c5   :  { %v3471_v4 = vld [vmem:[%s4938_s9 + $0x104] ss:$8 sps:$4 sm:$0xff]  }
 0x3c6   :  { %v1677_v6 = vpop.f32.mrf.mxu1 }
 0x3d5   :  { %v1713_v7 = vpop.f32.mrf.mxu0 }
 0x3d6   :  { %v1714_v11 = vadd.f32 %v1713_v7, %v1672_v0  ;;  %v3466_v0 = vld [vmem:[%s4938_s9 + $0x90] ss:$8 sps:$4 sm:$0xff]  }
 0x3d7   :  { %v1715_v12 = vpop.f32.mrf.mxu0 }
 0x3d8   :  { %v1754_v14 = vpop.f32.mrf.mxu1  ;;  %v1716_v15 = vadd.f32 %v1715_v12, %v1674_v3  ;;  %v3469_v3 = vld [vmem:[%s4938_s9 + $0x100] ss:$8 sps:$4 sm:$0xff]  }
 0x3d9   :  { %v1717_v16 = vpop.f32.mrf.mxu0  ;;  %v1755_v17 = vadd.f32 %v1754_v14, %v1714_v11  ;;  %v3474_v11 = vld [vmem:[%s4938_s9 + $0x84] ss:$8 sps:$4 sm:$0xff]  }
 0x3da   :  { %v1756_v19 = vpop.f32.mrf.mxu1 }
 0x3db   :  { %v1761_v20 = vmax.f32 %v1567_v54, %v1755_v17  ;;  %v1718_v34 = vpop.f32.mrf.mxu0  ;;  %v1757_v21 = vadd.f32 %v1756_v19, %v1716_v15  ;;  %v3456_v54 = vld [vmem:[%s4938_s9 + $0xb4] ss:$8 sps:$4 sm:$0xff]   ;;  %v3472_v15 = vld [vmem:[%s4938_s9 + $0x80] ss:$8 sps:$4 sm:$0xff]  }
 0x3dc   :  { %v1758_v25 = vpop.f32.mrf.mxu1 }
 0x3dd   :  { %v1775_v28 = vadd.f32 %v1768_v2, %v1761_v20  ;;  %v1762_v29 = vmax.f32 %v1569_v59, %v1757_v21  ;;  %v3462_v59 = vld [vmem:[%s4938_s9 + $0xa4] ss:$8 sps:$4 sm:$0xff]   ;;  %v3475_v20 = vld [vmem:[%s4940_s11 + $0x78] sm:$0xff]  }
 0x3de   :  { %v1759_v33 = vpop.f32.mrf.mxu1 }
 0x3df   :  { %v1776_v35 = vadd.f32 %v1772_v24, %v1762_v29  ;;  %v1777_v38 = vmax.f32 %v1775_v28, 0.0 }
 0x3e1   :  { %v1778_v39 = vmax.f32 %v1776_v35, 0.0  ;;  %v1779_v43 = vpack.c.bf16 %v1777_v38, %v1777_v38 }
 0x3e3   :  { %v1780_v44 = vpack.c.bf16 %v1778_v39, %v1778_v39  ;;  %v3476_v39 = vld [vmem:[%s4940_s11 + $0x38] sm:$0xff]  }
 0x3e5   :  { %2954 = vmatprep.mubr.msk.bf16.mxu0 %vm1861_vm11, %v1780_v44  ;;  %2965 = vmatprep.mubr.msk.bf16.mxu1 %vm1861_vm11, %v1780_v44 }
 0x3e6   :  { %1898 = vmatmul.mubr.bf16.vlgmr.msra.gmra.mxu0 %v1779_v43  ;;  %2018 = vmatmul.mubr.bf16.vlgmr.msra.gmra.mxu1 %v1779_v43 }
 0x3e7   :  { %2382 = vmatprep.mubr.bf16.mxu1 %v5009_v10  ;;  %2310 = vmatpush1.bf16.msra.mxu0 %v3415_v55  ;;  %v3423_v10 = vld [vmem:[%s4938_s9 + $0x54] ss:$8 sps:$4 sm:$0xff]  }
 0x3e8   :  { %2311 = vmatprep.subr.bf16.mxu0 %v3420_v41  ;;  %2359 = vmatpush1.bf16.msra.mxu1 %v3451_v45  ;;  %v3477_v55 = vld [vmem:[%s4940_s11 + $0x70] sm:$0xff]   ;;  %v3482_v45 = vld [vmem:[%s4940_s11 + $0x20] sm:$0xff]  }
 0x3e9   :  { %2360 = vmatprep.subr.bf16.mxu1 %v3459_v5  ;;  %v3484_v5 = vld [vmem:[%s4940_s11 + $0x18] sm:$0xff]  }
 0x3eb   :  { %2312 = vmatpush1.bf16.msra.mxu0 %v3418_v30  ;;  %v3478_v30 = vld [vmem:[%s4940_s11 + $0x30] sm:$0xff]  }
 0x3ec   :  { %2313 = vmatprep.subr.bf16.mxu0 %v3423_v10  ;;  %2361 = vmatpush1.bf16.msra.mxu1 %v3457_v23  ;;  %v3479_v10 = vld [vmem:[%s4940_s11 + $0x68] sm:$0xff]   ;;  %v3486_v23 = vld [vmem:[%s4940_s11 + $0x10] sm:$0xff]  }
 0x3ed   :  { %2362 = vmatprep.subr.bf16.mxu1 %v3465_v27  ;;  %v3488_v27 = vld [vmem:[%s4940_s11 + $0x8] sm:$0xff]  }
 0x3ef   :  { %2314 = vmatpush1.bf16.msra.mxu0 %v3421_v40  ;;  %v3480_v40 = vld [vmem:[%s4940_s11 + $0x28] sm:$0xff]  }
 0x3f0   :  { %2315 = vmatprep.subr.bf16.mxu0 %v3426_v32  ;;  %2363 = vmatpush1.bf16.msra.mxu1 %v3463_v56  ;;  %v3481_v32 = vld [vmem:[%s4940_s11 + $0x60] sm:$0xff]  }
 0x3f1   :  { %2364 = vmatprep.subr.bf16.mxu1 %v3471_v4  ;;  %v3490_v56 = vld [vmem:[%s4940_s11] sm:$0xff]  }
 0x3f2   :  { %v3494_v4 = vld [vmem:[%s4942_s13 + $0x20] sm:$0xff]  }
 0x3f3   :  { %2316 = vmatpush1.bf16.msra.mxu0 %v3424_v50  ;;  %v3485_v50 = vld [vmem:[%s4940_s11 + $0x50] sm:$0xff]  }
 0x3f4   :  { %2317 = vmatprep.subr.bf16.mxu0 %v3429_v52  ;;  %2365 = vmatpush1.bf16.msra.mxu1 %v3469_v3  ;;  %v3487_v52 = vld [vmem:[%s4940_s11 + $0x48] sm:$0xff]  }
 0x3f5   :  { %3039 = vmatprep.subr.bf16.mxu1 %v3475_v20  ;;  %v3493_v3 = vld [vmem:[%s4942_s13 + $0x28] sm:$0xff]  }
 0x3f7   :  { %2318 = vmatpush1.bf16.msra.mxu0 %v3427_v37  ;;  %v3489_v37 = vld [vmem:[%s4940_s11 + $0x40] sm:$0xff]  }
 0x3f8   :  { %2319 = vmatprep.subr.bf16.mxu0 %v3432_v13  ;;  %v3535_v13 = vmov 0.0  }
 0x3fb   :  { %2320 = vmatpush1.bf16.msra.mxu0 %v3430_v47  ;;  %v2093_v47 = vld [vmem:[%s4939_s10] sm:$0x3] }
 0x3fc   :  { %2321 = vmatprep.subr.bf16.mxu0 %v3435_v58  ;;  %v2098_v58 = vrot.slane %v2093_v47, %v5034_v18  ;;  %v3491_v18 = vld [vmem:[%s4942_s13 + $0x38] sm:$0xff]  }
 0x3ff   :  { %2322 = vmatpush1.bf16.msra.mxu0 %v3433_v48 }
 0x400   :  { %2323 = vmatprep.subr.bf16.mxu0 %v3438_v61  ;;  %v2102_v61 = vrot.slane %v2093_v47, %v5035_v22  ;;  %v3492_v22 = vld [vmem:[%s4942_s13 + $0x30] sm:$0xff]  }
 0x403   :  { %2324 = vmatpush1.bf16.msra.mxu0 %v3436_v36 }
 0x404   :  { %2325 = vmatprep.subr.bf16.mxu0 %v3441_v31 }
 0x407   :  { %2326 = vmatpush2.bf16.msra.mxu0 %v3439_v51 }
 0x408   :  { %2327 = vmatprep.subr.bf16.mxu0 %v3444_v62 }
 0x40b   :  { %2328 = vmatpush2.bf16.msra.mxu0 %v3442_v49 }
 0x40c   :  { %2329 = vmatprep.subr.bf16.mxu0 %v3447_v1 }
 0x40f   :  { %2330 = vmatpush2.bf16.msra.mxu0 %v3445_v46 }
 0x410   :  { %2331 = vmatprep.subr.bf16.mxu0 %v3450_v42 }
 0x413   :  { %2332 = vmatpush2.bf16.msra.mxu0 %v3448_v53 }
 0x414   :  { %2333 = vmatprep.subr.bf16.mxu0 %v3456_v54 }
 0x417   :  { %2334 = vmatpush2.bf16.msra.mxu0 %v3454_v57 }
 0x418   :  { %2335 = vmatprep.subr.bf16.mxu0 %v3462_v59 }
 0x41b   :  { %2336 = vmatpush2.bf16.msra.mxu0 %v3460_v60 }
 0x41c   :  { %2337 = vmatprep.subr.bf16.mxu0 %v3468_v63 }
 0x41f   :  { %2338 = vmatpush2.bf16.msra.mxu0 %v3466_v0 }
 0x420   :  { %2339 = vmatprep.subr.bf16.mxu0 %v3474_v11  ;;  %v3498_v11 = vld [vmem:[%s4942_s13] sm:$0xff]  }
 0x423   :  { %2340 = vmatpush2.bf16.msra.mxu0 %v3472_v15 }
 0x424   :  { %3095 = vmatprep.subr.bf16.mxu0 %v3535_v13 }
 0x4a6   :  { %v1899_v6 = vpop.f32.mrf.mxu0  ;;  %v2019_v7 = vpop.f32.mrf.mxu1 }
 0x4a7   :  { %v2025_v8 = vmax.f32 %v1899_v6, %v2019_v7  ;;  %v3495_v6 = vld [vmem:[%s4942_s13 + $0x18] sm:$0xff]   ;;  %v3496_v7 = vld [vmem:[%s4942_s13 + $0x10] sm:$0xff]  }
 0x4a8   :  { %v1901_v12 = vpop.f32.mrf.mxu0  ;;  %v2021_v14 = vpop.f32.mrf.mxu1 }
 0x4a9   :  { %2027 = vst.msk [vmem:[#allocation3] sm:$0xff] %vm2026_vm12, %v2025_v8  ;;  %v3497_v8 = vld [vmem:[%s4942_s13 + $0x8] sm:$0xff]   ;;  %v3499_v12 = vld [vmem:[%s4944_s15 + $0x18] sm:$0xff]   ;;  %v3500_v14 = vld [vmem:[%s4944_s15 + $0x10] sm:$0xff]  }
 0x4aa   :  { %v1902_v16 = vpop.f32.mrf.mxu0  ;;  %v2022_v17 = vpop.f32.mrf.mxu1 }
 0x4ab   :  { %v3007_v16 = vld [vmem:[%s4941_s12] ss:$0 sm:$0xff] }
 0x4ac   :  { %v1903_v2 = vpop.f32.mrf.mxu0  ;;  %v2023_v19 = vpop.f32.mrf.mxu1 }
 0x4b0   :  { %v2032_v34 = vld [vmem:[#allocation3 + $0x2] ss:$4 sm:$0x3]  ;;  %v2030_v21 = vld [vmem:[#allocation3 + $0x1] ss:$4 sm:$0x3] }
 0x4b1   :  { %2040 = vrot.lane.b32.xlu0 %v2032_v34, %s3533_s7  ;;  %2036 = vrot.lane.b32.xlu1 %v2030_v21, %s3534_s8  ;;  %v2034_v24 = vld [vmem:[#allocation3 + $0x3] ss:$4 sm:$0x3]  ;;  %v2028_v29 = vld [vmem:[#allocation3] ss:$4 sm:$0x3] }
 0x4b5   :  { %2044 = vrot.lane.b32.xlu1 %v2034_v24, %s3528_s28 }
 0x523   :  { %v2037_v25 = vpop.permute.xlu1 %2036  ;;  %v2041_v28 = vpop.permute.xlu0 %2040 }
 0x524   :  { %v2047_v33 = vsel %vm2026_vm12, %v2028_v29, %v2037_v25  ;;  %v2048_v35 = vsel %vm1861_vm11, %v2037_v25, %v2041_v28  ;;  %v3501_v25 = vld [vmem:[%s4944_s15 + $0x8] sm:$0xff]   ;;  %v3502_v28 = vld [vmem:[%s4944_s15] sm:$0xff]   ;;  %s2775_s15 = sshll.u32 %s3537_s23, 4  ;;  %s2776_s15 = int_to_ptr.vmem [resolvable:$true] %s2775_s15 }
 0x525   :  { %v2090_v41 = vpack.c.bf16 %v2047_v33, %v2047_v33  ;;  %v3024_v29 = vld [vmem:[%s4943_s14] ss:$0 sm:$0xff]  ;;  %s3503_s14 = scalar_lea.vmem %s2776_s15, 32  ;;  %p3508_p1 = scmp.lt.s32.totalorder %s2776_s15, %s2776_s15 }
 0x526   :  { %p3504_p0 = scmp.ne.s32.totalorder %s2776_s15, %s3503_s14  ;;  %p3509_p2 = scmp.lt.s32.totalorder %s3503_s14, %s3503_s14 }
 0x527   :  { %v2045_v38 = vpop.permute.xlu1 %2044 }
 0x528   :  { %v2049_v44 = vsel %vm118_vm4, %v2048_v35, %v2045_v38  ;;  %v2092_v43 = vpack.c.bf16 %v2045_v38, %v2045_v38  ;;  %p3510_p3 = por %p3509_p2, %p3508_p1 }
 0x529   :  { %v2091_v9 = vpack.c.bf16 %v2049_v44, %v2049_v44 }
 0x52a   :  { %3006 = vmatmul.mubr.msk.bf16.vlgmr.msra.gmra.mxu1 %vm2305_vm13, %v2092_v43  ;;  %p3511_p4 = pnand %p3510_p3, %p3504_p0 }
 0x52b   :  { %2341 = vmatprep.mubr.bf16.mxu0 %v2091_v9  ;;  %3040 = vmatpush3.bf16.msra.mxu1 %v3476_v39  ;;  %v3033_v9 = vld [vmem:[%s4945_s16] ss:$0 sm:$0xff] }
 0x52c   :  { %2342 = vmatmul.mubr.bf16.vlgmr.msra.gmra.mxu0 %v2090_v41  ;;  %3041 = vmatprep.subr.bf16.mxu1 %v3477_v55 }
 0x52d   :  { %3103 = vmatprep.mubr.msk.bf16.mxu0 %vm3536_vm14, %v3535_v13  ;;  %3096 = vmatpush3.bf16.msra.mxu0 %v3499_v12 }
 0x52e   :  { %3097 = vmatprep.subr.bf16.mxu0 %v3535_v13 }
 0x52f   :  { %3042 = vmatpush3.bf16.msra.mxu1 %v3478_v30 }
 0x530   :  { %3043 = vmatprep.subr.bf16.mxu1 %v3479_v10 }
 0x531   :  { %3098 = vmatpush3.bf16.msra.mxu0 %v3500_v14 }
 0x532   :  { %3099 = vmatprep.subr.bf16.mxu0 %v3535_v13 }
 0x533   :  { %3044 = vmatpush3.bf16.msra.mxu1 %v3480_v40 }
 0x534   :  { %3045 = vmatprep.subr.bf16.mxu1 %v3481_v32 }
 0x535   :  { %3100 = vmatpush3.bf16.msra.mxu0 %v3501_v25 }
 0x536   :  { %3101 = vmatprep.subr.bf16.mxu0 %v3535_v13 }
 0x537   :  { %3046 = vmatpush3.bf16.msra.mxu1 %v3482_v45 }
 0x538   :  { %3047 = vmatprep.subr.bf16.mxu1 %v3483_v26 }
 0x539   :  { %3102 = vmatpush3.bf16.msra.mxu0 %v3502_v28 }
 0x53b   :  { %3048 = vmatpush3.bf16.msra.mxu1 %v3484_v5 }
 0x53c   :  { %3049 = vmatprep.subr.bf16.mxu1 %v3485_v50 }
 0x53f   :  { %3050 = vmatpush3.bf16.msra.mxu1 %v3486_v23 }
 0x540   :  { %3051 = vmatprep.subr.bf16.mxu1 %v3487_v52 }
 0x543   :  { %3052 = vmatpush3.bf16.msra.mxu1 %v3488_v27 }
 0x544   :  { %3053 = vmatprep.subr.bf16.mxu1 %v3489_v37 }
 0x547   :  { %3054 = vmatpush3.bf16.msra.mxu1 %v3490_v56 }
 0x548   :  { %3075 = vmatprep.subr.bf16.mxu1 %v3535_v13 }
 0x5ea   :  { %v2384_v48 = vpop.f32.mrf.mxu1 }
 0x5ec   :  { %v2343_v36 = vpop.f32.mrf.mxu0  ;;  %v2386_v31 = vpop.f32.mrf.mxu1 }
 0x5ed   :  { %v2344_v51 = vadd.f32 %v2343_v36, %v2098_v58 }
 0x5ee   :  { %v2345_v62 = vpop.f32.mrf.mxu0  ;;  %v2388_v49 = vpop.f32.mrf.mxu1 }
 0x5ef   :  { %v2385_v1 = vadd.f32 %v2384_v48, %v2344_v51  ;;  %v2346_v46 = vadd.f32 %v2345_v62, %v2102_v61 }
 0x5f0   :  { %v2347_v42 = vpop.f32.mrf.mxu0  ;;  %v2389_v53 = vpop.f32.mrf.mxu1 }
 0x5f1   :  { %v2387_v54 = vadd.f32 %v2386_v31, %v2346_v46  ;;  %v2391_v57 = vmax.f32 %v2385_v1, 0.0 }
 0x5f2   :  { %v2348_v59 = vpop.f32.mrf.mxu0 }
 0x5f3   :  { %v2392_v60 = vmax.f32 %v2387_v54, 0.0  ;;  %v2425_v0 = vpack.c.bf16 %v2391_v57, %v2391_v57 }
 0x5f5   :  { %v2426_v63 = vpack.c.bf16 %v2392_v60, %v2392_v60 }
 0x5f7   :  { %2562 = vmatprep.mubr.bf16.mxu1 %v2426_v63 }
 0x5f8   :  { %2563 = vmatmul.mubr.bf16.vlgmr.msra.gmra.mxu1 %v2425_v0 }
 0x5f9   :  { %3076 = vmatpush3.bf16.msra.mxu1 %v3491_v18  ;;  %3091 = vmatprep.mubr.msk.bf16.mxu1 %vm3536_vm14, %v3535_v13 }
 0x5fa   :  { %3077 = vmatprep.subr.bf16.mxu1 %v3535_v13 }
 0x5fd   :  { %3078 = vmatpush3.bf16.msra.mxu1 %v3492_v22 }
 0x5fe   :  { %3079 = vmatprep.subr.bf16.mxu1 %v3535_v13 }
 0x601   :  { %3080 = vmatpush3.bf16.msra.mxu1 %v3493_v3 }
 0x602   :  { %3081 = vmatprep.subr.bf16.mxu1 %v3535_v13 }
 0x605   :  { %3082 = vmatpush3.bf16.msra.mxu1 %v3494_v4 }
 0x606   :  { %3083 = vmatprep.subr.bf16.mxu1 %v3535_v13 }
 0x609   :  { %3084 = vmatpush3.bf16.msra.mxu1 %v3495_v6 }
 0x60a   :  { %3085 = vmatprep.subr.bf16.mxu1 %v3535_v13 }
 0x60d   :  { %3086 = vmatpush3.bf16.msra.mxu1 %v3496_v7 }
 0x60e   :  { %3087 = vmatprep.subr.bf16.mxu1 %v3535_v13 }
 0x611   :  { %3088 = vmatpush3.bf16.msra.mxu1 %v3497_v8 }
 0x612   :  { %3089 = vmatprep.subr.bf16.mxu1 %v3535_v13 }
 0x615   :  { %3090 = vmatpush3.bf16.msra.mxu1 %v3498_v11 }
 0x6b8   :  { %v3055_v15 = vpop.f32.mrf.mxu1 }
 0x6ba   :  { %v3056_v17 = vpop.f32.mrf.mxu1 }
 0x6bb   :  { %v3057_v2 = vadd.f32 %v3056_v17, %v3055_v15 }
 0x6bc   :  { %v3058_v19 = vpop.f32.mrf.mxu1 }
 0x6bd   :  { %v2565_v20 = vadd.f32 %v3057_v2, %v3007_v16 }
 0x6be   :  { %v3059_v34 = vpop.f32.mrf.mxu1 }
 0x6bf   :  { %v2570_v21 = vmax.f32 %v2565_v20, 0.0 }
 0x6c1   :  { %v2587_v24 = vpack.c.bf16 %v2570_v21, %v2570_v21 }
 0x6c3   :  { %3092 = vmatmul.mubr.bf16.vlgmr.msra.gmra.mxu1 %v2587_v24 }
 0x783   :  { %v2677_v33 = vpop.f32.mrf.mxu1 }
 0x784   :  { %v2678_v35 = vadd.f32 %v3024_v29, %v2677_v33 }
 0x785   :  { %v3093_v38 = vpop.f32.mrf.mxu1 }
 0x786   :  { %v2683_v39 = vmax.f32 %v2678_v35, 0.0 }
 0x787   :  { %v2680_v44 = vpop.f32.mrf.mxu1 }
 0x788   :  { %v2692_v43 = vpack.c.bf16 %v2683_v39, %v2683_v39 }
 0x789   :  { %v3094_v55 = vpop.f32.mrf.mxu1 }
 0x78a   :  { %3104 = vmatmul.mubr.msk.bf16.vlgmr.msra.gmra.mxu0 %vm2305_vm13, %v2692_v43 }
 0x84a   :  { %v2761_v41 = vpop.f32.mrf.mxu0 }
 0x84b   :  { %v2762_v30 = vadd.f32 %v3033_v9, %v2761_v41 }
 0x84c   :  { %v3105_v10 = vpop.f32.mrf.mxu0 }
 0x84d   :  { %2768 = vst.msk [vmem:[#allocation4] sm:$0x3] %vm2767_vm15, %v2762_v30 }
 0x84e   :  { %v2764_v40 = vpop.f32.mrf.mxu0 }
 0x84f   :  { %3514 = shalt.err (!%p3511_p4)
}
 0x850   :  { %2778 = dma.vmem_to_hbm [thread:$0]  %s2776_s15, 32, %s4946_s17, [#allocation5]   ;;  %v3106_v32 = vpop.f32.mrf.mxu0 }
 0x851   :  { %3523 = dma.done.wait [#allocation5], 32  }
 0x852   :  { %3524 = vsyncadd [#allocation5], 4294967264 }
 0x853   :  { %2782 = vsyncpa [#allocation5], 1 }

</bundles_post_ra>
